<compile_context>
chip_gen: v6e
topology: v6e:2x2x1
jax: 0.10.0
libtpu: 0.0.40
codegen_flags: <defaults>
</compile_context>

<pallas_src>
import functools

import jax
import jax.numpy as jnp
from jax.experimental import pallas as pl
from jax.experimental.pallas import tpu as pltpu


# ---------------------------------------------------------------------------
# Fused kernel: edge MLP + A-node MLP per tile, b_neigh accumulation in
# scratch, B-node MLP at the last grid step.
# ---------------------------------------------------------------------------
def _fused_kernel(edge_ref, a_ref, b_ref, bctr_ref,
                  w1e_a_ref, w1e_e_ref, w2e_ref, b2e_ref,
                  w1n_n_ref, w1n_e_ref, b1n_ref, w2n_ref, b2n_ref,
                  edge_out_ref, a_out_ref, b_out_ref,
                  b_acc_ref,
                  *, wide_out, tile_a, valid_a):
    """Per-grid-step shapes (f32):
      edge_ref : (tile_a*B, 2E)   a_ref : (tile_a, N)
      b_ref    : (B, N)           bctr_ref : (B, E)   (nodes_b @ w1e_b + b1e)
      edge_out : (tile_a, B*E) if wide_out else (tile_a*B, E)
      a_out    : (tile_a, N)      b_out : (B, N)      b_acc : (B, E) scratch
    """
    i = pl.program_id(0)
    last = pl.num_programs(0) - 1
    ta = a_ref.shape[0]
    nb = b_ref.shape[0]
    e_dim = w2e_ref.shape[0]

    @pl.when(i == 0)
    def _init():
        b_acc_ref[...] = jnp.zeros_like(b_acc_ref)

    edge = edge_ref[...]                                   # (ta*nb, 2E)
    a = a_ref[...]                                         # (ta, N)

    # ---- edge MLP: first Linear split so the (ta*nb, 2N+2E) concat is never
    #      materialized; the B-side partial + bias comes in precomputed. ----
    a_part = jnp.dot(a, w1e_a_ref[...], preferred_element_type=jnp.float32)      # (ta, E)
    e_part = jnp.dot(edge, w1e_e_ref[...], preferred_element_type=jnp.float32)   # (ta*nb, E)

    # Keep the first-layer sum 3-D: no (ta*nb, E) broadcast temporary.
    h1 = jnp.maximum(
        e_part.reshape(ta, nb, e_dim)
        + a_part[:, None, :]
        + bctr_ref[...][None, :, :],
        0.0)                                               # (ta, nb, E)

    h2 = jnp.dot(h1.reshape(ta * nb, e_dim), w2e_ref[...],
                 preferred_element_type=jnp.float32) + b2e_ref[...]
    lat = jnp.maximum(h2, 0.0)                             # (ta*nb, E)
    lat3 = lat.reshape(ta, nb, e_dim)                      # cheap leading-dim regroup

    # ---- store edge_latent ----
    if wide_out:
        # Lane-dense store: merge (nb, E) into the lane axis once (512 lanes).
        edge_out_ref[...] = lat.reshape(ta, nb * e_dim)
    else:
        edge_out_ref[...] = lat                            # masked 32-lane stores

    # ---- b_neigh accumulation (mask zero-padded A rows if any) ----
    if valid_a is not None:
        row = jax.lax.broadcasted_iota(jnp.int32, (ta, 1, 1), 0) + i * tile_a
        lat3_for_b = jnp.where(row < valid_a, lat3, 0.0)
    else:
        lat3_for_b = lat3
    b_acc_ref[...] += jnp.sum(lat3_for_b, axis=0)          # (nb, E)

    # ---- A-side node MLP for this tile ----
    a_neigh = jnp.sum(lat3, axis=1)                        # (ta, E)
    ha = jnp.maximum(
        jnp.dot(a, w1n_n_ref[...], preferred_element_type=jnp.float32)
        + jnp.dot(a_neigh, w1n_e_ref[...], preferred_element_type=jnp.float32)
        + b1n_ref[...], 0.0)
    a_out_ref[...] = jnp.maximum(
        jnp.dot(ha, w2n_ref[...], preferred_element_type=jnp.float32) + b2n_ref[...],
        0.0)

    # ---- B-side node MLP once, after the full b_neigh sum ----
    @pl.when(i == last)
    def _finalize_b():
        b = b_ref[...]
        hb = jnp.maximum(
            jnp.dot(b, w1n_n_ref[...], preferred_element_type=jnp.float32)
            + jnp.dot(b_acc_ref[...], w1n_e_ref[...], preferred_element_type=jnp.float32)
            + b1n_ref[...], 0.0)
        b_out_ref[...] = jnp.maximum(
            jnp.dot(hb, w2n_ref[...], preferred_element_type=jnp.float32) + b2n_ref[...],
            0.0)


# ---------------------------------------------------------------------------
# Tiling / VMEM heuristics
# ---------------------------------------------------------------------------
def _vmem_limit_bytes():
    """Scoped-VMEM limit: ~3/4 of capacity (96 MiB v5e/v6e, 48 MiB v7x)."""
    try:
        cap = int(pltpu.get_tpu_info().vmem_capacity_bytes)
    except Exception:
        cap = 64 * 1024 * 1024          # conservative (v7x-sized) fallback
    return (cap * 3) // 4


def _pick_tile_a(A, B, E, N, vmem_limit_bytes):
    """Largest multiple-of-8 tile whose live set fits the scoped VMEM budget.

    Uses lane-padded widths (ceil(w/128)*128) for the sub-128 dims and counts
    the real live set: double-buffered edge-in and edge-out blocks plus the
    f32 intermediates (edge value, e_part, h1, latent, wide relayout temp)."""
    lane = lambda w: -(-w // 128) * 128
    per_row = 4 * (
        2 * B * lane(2 * E)      # edge-in block, double-buffered
        + 2 * lane(B * E)        # lane-dense edge-out block, double-buffered
        + B * lane(2 * E)        # edge value live
        + 3 * B * lane(E)        # e_part, h1, latent
        + lane(B * E)            # wide relayout temporary
        + 4 * lane(N)            # a-in / a-out blocks + a_neigh / ha
    )
    fixed = 2 * 1024 * 1024      # weights, nodes_b, b_contrib, scratch, slack
    budget = int(vmem_limit_bytes * 0.8) - fixed
    max_rows = max(8, (budget // max(per_row, 1)) // 8 * 8)
    a_pad8 = -(-A // 8) * 8
    return max(8, min(a_pad8, max_rows))


# ---------------------------------------------------------------------------
# Wrapper
# ---------------------------------------------------------------------------
def bipartite_mp_forward(edge_embeds, nodes_a, nodes_b, params, tile_a=None):
    A, B, twoE = edge_embeds.shape
    E = twoE // 2
    N = nodes_a.shape[-1]

    (w1e_a, w1e_e, w1e_b, b1e, w2e, b2e,
     w1n_n, w1n_e, b1n, w2n, b2n) = params

    vmem_limit = _vmem_limit_bytes()
    if tile_a is None:
        tile_a = _pick_tile_a(A, B, E, N, vmem_limit)
    tile_a = max(8, (int(tile_a) // 8) * 8)

    n_tiles = pl.cdiv(A, tile_a)
    A_pad = n_tiles * tile_a
    valid_a = A if A_pad != A else None          # mask padded rows in b_neigh

    edge_in, a_in = edge_embeds, nodes_a
    if A_pad != A:
        edge_in = jnp.pad(edge_embeds, ((0, A_pad - A), (0, 0), (0, 0)))
        a_in = jnp.pad(nodes_a, ((0, A_pad - A), (0, 0)))

    # Grid-invariant B-side first-layer term (includes the edge-MLP bias):
    # tiny XLA matmul, removes a per-grid-step recompute from the kernel.
    b_contrib = nodes_b @ w1e_b + b1e            # (B, E)

    # Flatten (A, B, .) -> (A*B, .): free XLA reshape; one big M = tile_a*B
    # MXU matmul per grid step and contiguous DMA slabs.
    edge2d = edge_in.reshape(A_pad * B, twoE)

    def whole(x):
        return pl.BlockSpec(x.shape, lambda i, _n=x.ndim: (0,) * _n)

    weights = (w1e_a, w1e_e, w2e, b2e, w1n_n, w1n_e, b1n, w2n, b2n)

    def run(wide_out):
        kernel = functools.partial(_fused_kernel, wide_out=wide_out,
                                   tile_a=tile_a, valid_a=valid_a)
        in_specs = [
            pl.BlockSpec((tile_a * B, twoE), lambda i: (i, 0)),   # edge tile
            pl.BlockSpec((tile_a, N), lambda i: (i, 0)),          # nodes_a tile
            whole(nodes_b),
            whole(b_contrib),
        ] + [whole(w) for w in weights]

        if wide_out:
            edge_shape = jax.ShapeDtypeStruct((A_pad, B * E), jnp.float32)
            edge_spec = pl.BlockSpec((tile_a, B * E), lambda i: (i, 0))
        else:
            edge_shape = jax.ShapeDtypeStruct((A_pad * B, E), jnp.float32)
            edge_spec = pl.BlockSpec((tile_a * B, E), lambda i: (i, 0))

        out_shape = (
            edge_shape,                                            # edge_latent
            jax.ShapeDtypeStruct((A_pad, N), jnp.float32),         # nodes_a out
            jax.ShapeDtypeStruct((B, N), jnp.float32),             # nodes_b out
        )
        out_specs = (
            edge_spec,
            pl.BlockSpec((tile_a, N), lambda i: (i, 0)),
            pl.BlockSpec((B, N), lambda i: (0, 0)),                # resident
        )

        edge_out, a_out, b_out = pl.pallas_call(
            kernel,
            out_shape=out_shape,
            grid=(n_tiles,),
            in_specs=in_specs,
            out_specs=out_specs,
            scratch_shapes=[pltpu.VMEM((B, E), jnp.float32)],      # b_neigh acc
            compiler_params=pltpu.CompilerParams(
                dimension_semantics=("arbitrary",),   # sequential: scratch acc
                vmem_limit_bytes=vmem_limit),
        )(edge2d, a_in, nodes_b, b_contrib, *weights)

        if wide_out:
            edge_latent = edge_out[:A].reshape(A, B, E)
        else:
            edge_latent = edge_out[:A * B].reshape(A, B, E)
        return edge_latent, a_out[:A], b_out

    try:
        outs = run(wide_out=True)
        jax.block_until_ready(outs)
        return outs
    except Exception:
        # Fallback: if this Mosaic build cannot lower the in-kernel
        # sublane->lane merge, keep the (A*B, E) output layout (lane-masked
        # stores) rather than failing.
        return run(wide_out=False)


# ---------------------------------------------------------------------------
# Parameters + pure-JAX reference
# ---------------------------------------------------------------------------
def init_params(key, node_dim, edge_dim):
    """Deterministic PyTorch-Linear-style init; weights stored as (in, out)."""
    N, E = node_dim, edge_dim
    edge_in_dim = 2 * N + 2 * E
    node_in_dim = N + E

    def linear(key, fan_in, fan_out):
        kw, kb = jax.random.split(key)
        bound = 1.0 / jnp.sqrt(fan_in)
        w = jax.random.uniform(kw, (fan_in, fan_out), jnp.float32, -bound, bound)
        b = jax.random.uniform(kb, (1, fan_out), jnp.float32, -bound, bound)
        return w, b

    k1, k2, k3, k4 = jax.random.split(key, 4)
    w1e, b1e = linear(k1, edge_in_dim, E)   # edge_mlp[0]
    w2e, b2e = linear(k2, E, E)             # edge_mlp[3]
    w1n, b1n = linear(k3, node_in_dim, N)   # node_mlp[0]
    w2n, b2n = linear(k4, N, N)             # node_mlp[3]

    # Split first-layer weights to match torch's concat order:
    # edge_in = cat(nodes_a, edge_embeds, nodes_b) -> rows [0:N, N:N+2E, N+2E:]
    # node_in = cat(nodes,   neigh)                -> rows [0:N, N:N+E]
    w1e_a = w1e[:N]
    w1e_e = w1e[N:N + 2 * E]
    w1e_b = w1e[N + 2 * E:]
    w1n_n = w1n[:N]
    w1n_e = w1n[N:]

    return (w1e_a, w1e_e, w1e_b, b1e, w2e, b2e,
            w1n_n, w1n_e, b1n, w2n, b2n)


def reference_forward(edge_embeds, nodes_a, nodes_b, params):
    """Pure-JAX mirror of the PyTorch module (dropout=0)."""
    (w1e_a, w1e_e, w1e_b, b1e, w2e, b2e,
     w1n_n, w1n_e, b1n, w2n, b2n) = params
    A, B, _ = edge_embeds.shape
    a_in = jnp.broadcast_to(nodes_a[:, None, :], (A, B, nodes_a.shape[-1]))
    b_in = jnp.broadcast_to(nodes_b[None, :, :], (A, B, nodes_b.shape[-1]))
    edge_in = jnp.concatenate((a_in, edge_embeds, b_in), axis=-1)
    w1e = jnp.concatenate((w1e_a, w1e_e, w1e_b), axis=0)
    h = jnp.maximum(edge_in @ w1e + b1e[None], 0.0)
    edge_latent = jnp.maximum(h @ w2e + b2e[None], 0.0)

    a_neigh = edge_latent.sum(axis=1)
    b_neigh = edge_latent.sum(axis=0)
    w1n = jnp.concatenate((w1n_n, w1n_e), axis=0)

    def node_mlp(nodes, neigh):
        x = jnp.concatenate((nodes, neigh), axis=-1)
        h = jnp.maximum(x @ w1n + b1n, 0.0)
        return jnp.maximum(h @ w2n + b2n, 0.0)

    return edge_latent, node_mlp(nodes_a, a_neigh), node_mlp(nodes_b, b_neigh)


if __name__ == "__main__":
    node_dim, edge_dim = 32, 32
    A, B = 16, 16

    key = jax.random.PRNGKey(0)
    k_e, k_a, k_b, k_p = jax.random.split(key, 4)

    edge_embeds = jax.random.normal(k_e, (A, B, 2 * edge_dim), jnp.float32)
    nodes_a = jax.random.normal(k_a, (A, node_dim), jnp.float32)
    nodes_b = jax.random.normal(k_b, (B, node_dim), jnp.float32)
    params = init_params(k_p, node_dim, edge_dim)

    # tile_a=8 -> grid=(2,) to exercise multi-tile scratch accumulation and
    # the init / finalize pl.when paths.
    edge_out, a_out, b_out = bipartite_mp_forward(
        edge_embeds, nodes_a, nodes_b, params, tile_a=8)
    jax.block_until_ready((edge_out, a_out, b_out))

    ref_edge, ref_a, ref_b = reference_forward(edge_embeds, nodes_a, nodes_b, params)
    assert jnp.allclose(edge_out, ref_edge, atol=1e-4, rtol=1e-4)
    assert jnp.allclose(a_out, ref_a, atol=1e-4, rtol=1e-4)
    assert jnp.allclose(b_out, ref_b, atol=1e-4, rtol=1e-4)

    print("KERNEL_OK")
</pallas_src>

<mosaic_0001>
module attributes {stable_mosaic.version = 11 : i64} {
  func.func @_fused_kernel(%arg0: i32, %arg1: memref<128x64xf32, #tpu.memory_space<vmem>>, %arg2: memref<8x32xf32, #tpu.memory_space<vmem>>, %arg3: memref<16x32xf32, #tpu.memory_space<vmem>>, %arg4: memref<16x32xf32, #tpu.memory_space<vmem>>, %arg5: memref<32x32xf32, #tpu.memory_space<vmem>>, %arg6: memref<64x32xf32, #tpu.memory_space<vmem>>, %arg7: memref<32x32xf32, #tpu.memory_space<vmem>>, %arg8: memref<1x32xf32, #tpu.memory_space<vmem>>, %arg9: memref<32x32xf32, #tpu.memory_space<vmem>>, %arg10: memref<32x32xf32, #tpu.memory_space<vmem>>, %arg11: memref<1x32xf32, #tpu.memory_space<vmem>>, %arg12: memref<32x32xf32, #tpu.memory_space<vmem>>, %arg13: memref<1x32xf32, #tpu.memory_space<vmem>>, %arg14: memref<8x512xf32, #tpu.memory_space<vmem>>, %arg15: memref<8x32xf32, #tpu.memory_space<vmem>>, %arg16: memref<16x32xf32, #tpu.memory_space<vmem>>, %arg17: memref<16x32xf32, #tpu.memory_space<vmem>>) attributes {dimension_semantics = [#tpu.dimension_semantics<arbitrary>], iteration_bounds = array<i64: 2>, scalar_prefetch = 0 : i64, scratch_operands = 1 : i64, tpu.core_type = #tpu.core_type<tc>, window_params = [{transform_indices = @transform_0, window_bounds = array<i64: 128, 64>}, {transform_indices = @transform_1, window_bounds = array<i64: 8, 32>}, {pipeline_mode = #tpu.pipeline_mode<synchronous>, transform_indices = @transform_2, window_bounds = array<i64: 16, 32>}, {pipeline_mode = #tpu.pipeline_mode<synchronous>, transform_indices = @transform_3, window_bounds = array<i64: 16, 32>}, {pipeline_mode = #tpu.pipeline_mode<synchronous>, transform_indices = @transform_4, window_bounds = array<i64: 32, 32>}, {pipeline_mode = #tpu.pipeline_mode<synchronous>, transform_indices = @transform_5, window_bounds = array<i64: 64, 32>}, {pipeline_mode = #tpu.pipeline_mode<synchronous>, transform_indices = @transform_6, window_bounds = array<i64: 32, 32>}, {pipeline_mode = #tpu.pipeline_mode<synchronous>, transform_indices = @transform_7, window_bounds = array<i64: 1, 32>}, {pipeline_mode = #tpu.pipeline_mode<synchronous>, transform_indices = @transform_8, window_bounds = array<i64: 32, 32>}, {pipeline_mode = #tpu.pipeline_mode<synchronous>, transform_indices = @transform_9, window_bounds = array<i64: 32, 32>}, {pipeline_mode = #tpu.pipeline_mode<synchronous>, transform_indices = @transform_10, window_bounds = array<i64: 1, 32>}, {pipeline_mode = #tpu.pipeline_mode<synchronous>, transform_indices = @transform_11, window_bounds = array<i64: 32, 32>}, {pipeline_mode = #tpu.pipeline_mode<synchronous>, transform_indices = @transform_12, window_bounds = array<i64: 1, 32>}, {transform_indices = @transform_13, window_bounds = array<i64: 8, 512>}, {transform_indices = @transform_14, window_bounds = array<i64: 8, 32>}, {pipeline_mode = #tpu.pipeline_mode<synchronous>, transform_indices = @transform_15, window_bounds = array<i64: 16, 32>}]} {
    %c0_i32 = arith.constant 0 : i32
    %0 = arith.cmpi eq, %arg0, %c0_i32 : i32
    %1 = arith.extui %0 : i1 to i32
    %c0_i32_0 = arith.constant 0 : i32
    %2 = arith.cmpi ne, %1, %c0_i32_0 : i32
    scf.if %2 {
      %cst_44 = arith.constant 0.000000e+00 : f32
      %56 = vector.broadcast %cst_44 : f32 to vector<16x32xf32>
      %c0_45 = arith.constant 0 : index
      %c0_46 = arith.constant 0 : index
      %57 = vector.load %arg17[%c0_45, %c0_46] : memref<16x32xf32, #tpu.memory_space<vmem>>, vector<16x32xf32>
      tpu.vector_store %arg17[%c0_45, %c0_46], %56 {strides = array<i32>} : memref<16x32xf32, #tpu.memory_space<vmem>>, vector<16x32xf32>,
    } else {
    }
    %c0 = arith.constant 0 : index
    %c0_1 = arith.constant 0 : index
    %3 = vector.load %arg1[%c0, %c0_1] : memref<128x64xf32, #tpu.memory_space<vmem>>, vector<128x64xf32>
    %c0_2 = arith.constant 0 : index
    %c0_3 = arith.constant 0 : index
    %4 = vector.load %arg2[%c0_2, %c0_3] : memref<8x32xf32, #tpu.memory_space<vmem>>, vector<8x32xf32>
    %c0_4 = arith.constant 0 : index
    %c0_5 = arith.constant 0 : index
    %5 = vector.load %arg5[%c0_4, %c0_5] : memref<32x32xf32, #tpu.memory_space<vmem>>, vector<32x32xf32>
    %cst = arith.constant dense<0.000000e+00> : vector<8x32xf32>
    %6 = tpu.matmul %4, %5, %cst {dimension_numbers = #tpu.dot_dimension_numbers<[1], [0], [0], [1], [0, 0, 1, 1], [], []>} : vector<8x32xf32>, vector<32x32xf32>, vector<8x32xf32> -> vector<8x32xf32>
    %c0_6 = arith.constant 0 : index
    %c0_7 = arith.constant 0 : index
    %7 = vector.load %arg6[%c0_6, %c0_7] : memref<64x32xf32, #tpu.memory_space<vmem>>, vector<64x32xf32>
    %cst_8 = arith.constant dense<0.000000e+00> : vector<128x32xf32>
    %8 = tpu.matmul %3, %7, %cst_8 {dimension_numbers = #tpu.dot_dimension_numbers<[1], [0], [0], [1], [0, 0, 1, 1], [], []>} : vector<128x64xf32>, vector<64x32xf32>, vector<128x32xf32> -> vector<128x32xf32>
    %9 = vector.shape_cast %8 : vector<128x32xf32> to vector<8x16x32xf32>
    %10 = vector.shape_cast %6 : vector<8x32xf32> to vector<8x1x32xf32>
    %11 = vector.broadcast %10 : vector<8x1x32xf32> to vector<8x16x32xf32>
    %12 = arith.addf %9, %11 : vector<8x16x32xf32>
    %c0_9 = arith.constant 0 : index
    %c0_10 = arith.constant 0 : index
    %13 = vector.load %arg4[%c0_9, %c0_10] : memref<16x32xf32, #tpu.memory_space<vmem>>, vector<16x32xf32>
    %14 = vector.shape_cast %13 : vector<16x32xf32> to vector<1x16x32xf32>
    %15 = vector.broadcast %14 : vector<1x16x32xf32> to vector<8x16x32xf32>
    %16 = arith.addf %12, %15 : vector<8x16x32xf32>
    %cst_11 = arith.constant 0.000000e+00 : f32
    %17 = vector.broadcast %cst_11 : f32 to vector<8x16x32xf32>
    %18 = arith.maximumf %16, %17 : vector<8x16x32xf32>
    %19 = vector.shape_cast %18 : vector<8x16x32xf32> to vector<128x32xf32>
    %c0_12 = arith.constant 0 : index
    %c0_13 = arith.constant 0 : index
    %20 = vector.load %arg7[%c0_12, %c0_13] : memref<32x32xf32, #tpu.memory_space<vmem>>, vector<32x32xf32>
    %cst_14 = arith.constant dense<0.000000e+00> : vector<128x32xf32>
    %21 = tpu.matmul %19, %20, %cst_14 {dimension_numbers = #tpu.dot_dimension_numbers<[1], [0], [0], [1], [0, 0, 1, 1], [], []>} : vector<128x32xf32>, vector<32x32xf32>, vector<128x32xf32> -> vector<128x32xf32>
    %c0_15 = arith.constant 0 : index
    %c0_16 = arith.constant 0 : index
    %22 = vector.load %arg8[%c0_15, %c0_16] : memref<1x32xf32, #tpu.memory_space<vmem>>, vector<1x32xf32>
    %23 = vector.broadcast %22 : vector<1x32xf32> to vector<128x32xf32>
    %24 = arith.addf %21, %23 : vector<128x32xf32>
    %cst_17 = arith.constant 0.000000e+00 : f32
    %25 = vector.broadcast %cst_17 : f32 to vector<128x32xf32>
    %26 = arith.maximumf %24, %25 : vector<128x32xf32>
    %27 = vector.shape_cast %26 : vector<128x32xf32> to vector<8x16x32xf32>
    %28 = vector.shape_cast %26 : vector<128x32xf32> to vector<8x512xf32>
    %c0_18 = arith.constant 0 : index
    %c0_19 = arith.constant 0 : index
    %29 = vector.load %arg14[%c0_18, %c0_19] : memref<8x512xf32, #tpu.memory_space<vmem>>, vector<8x512xf32>
    tpu.vector_store %arg14[%c0_18, %c0_19], %28 {strides = array<i32>} : memref<8x512xf32, #tpu.memory_space<vmem>>, vector<8x512xf32>,
    %c0_20 = arith.constant 0 : index
    %c0_21 = arith.constant 0 : index
    %30 = vector.load %arg17[%c0_20, %c0_21] : memref<16x32xf32, #tpu.memory_space<vmem>>, vector<16x32xf32>
    %cst_22 = arith.constant dense<0.000000e+00> : vector<16x32xf32>
    %31 = vector.multi_reduction <add>, %27, %cst_22 [0] : vector<8x16x32xf32> to vector<16x32xf32>
    %32 = arith.addf %30, %31 : vector<16x32xf32>
    %c0_23 = arith.constant 0 : index
    %c0_24 = arith.constant 0 : index
    %33 = vector.load %arg17[%c0_23, %c0_24] : memref<16x32xf32, #tpu.memory_space<vmem>>, vector<16x32xf32>
    tpu.vector_store %arg17[%c0_23, %c0_24], %32 {strides = array<i32>} : memref<16x32xf32, #tpu.memory_space<vmem>>, vector<16x32xf32>,
    %cst_25 = arith.constant dense<0.000000e+00> : vector<8x32xf32>
    %34 = vector.multi_reduction <add>, %27, %cst_25 [1] : vector<8x16x32xf32> to vector<8x32xf32>
    %c0_26 = arith.constant 0 : index
    %c0_27 = arith.constant 0 : index
    %35 = vector.load %arg9[%c0_26, %c0_27] : memref<32x32xf32, #tpu.memory_space<vmem>>, vector<32x32xf32>
    %cst_28 = arith.constant dense<0.000000e+00> : vector<8x32xf32>
    %36 = tpu.matmul %4, %35, %cst_28 {dimension_numbers = #tpu.dot_dimension_numbers<[1], [0], [0], [1], [0, 0, 1, 1], [], []>} : vector<8x32xf32>, vector<32x32xf32>, vector<8x32xf32> -> vector<8x32xf32>
    %c0_29 = arith.constant 0 : index
    %c0_30 = arith.constant 0 : index
    %37 = vector.load %arg10[%c0_29, %c0_30] : memref<32x32xf32, #tpu.memory_space<vmem>>, vector<32x32xf32>
    %cst_31 = arith.constant dense<0.000000e+00> : vector<8x32xf32>
    %38 = tpu.matmul %34, %37, %cst_31 {dimension_numbers = #tpu.dot_dimension_numbers<[1], [0], [0], [1], [0, 0, 1, 1], [], []>} : vector<8x32xf32>, vector<32x32xf32>, vector<8x32xf32> -> vector<8x32xf32>
    %39 = arith.addf %36, %38 : vector<8x32xf32>
    %c0_32 = arith.constant 0 : index
    %c0_33 = arith.constant 0 : index
    %40 = vector.load %arg11[%c0_32, %c0_33] : memref<1x32xf32, #tpu.memory_space<vmem>>, vector<1x32xf32>
    %41 = vector.broadcast %40 : vector<1x32xf32> to vector<8x32xf32>
    %42 = arith.addf %39, %41 : vector<8x32xf32>
    %cst_34 = arith.constant 0.000000e+00 : f32
    %43 = vector.broadcast %cst_34 : f32 to vector<8x32xf32>
    %44 = arith.maximumf %42, %43 : vector<8x32xf32>
    %c0_35 = arith.constant 0 : index
    %c0_36 = arith.constant 0 : index
    %45 = vector.load %arg12[%c0_35, %c0_36] : memref<32x32xf32, #tpu.memory_space<vmem>>, vector<32x32xf32>
    %cst_37 = arith.constant dense<0.000000e+00> : vector<8x32xf32>
    %46 = tpu.matmul %44, %45, %cst_37 {dimension_numbers = #tpu.dot_dimension_numbers<[1], [0], [0], [1], [0, 0, 1, 1], [], []>} : vector<8x32xf32>, vector<32x32xf32>, vector<8x32xf32> -> vector<8x32xf32>
    %c0_38 = arith.constant 0 : index
    %c0_39 = arith.constant 0 : index
    %47 = vector.load %arg13[%c0_38, %c0_39] : memref<1x32xf32, #tpu.memory_space<vmem>>, vector<1x32xf32>
    %48 = vector.broadcast %47 : vector<1x32xf32> to vector<8x32xf32>
    %49 = arith.addf %46, %48 : vector<8x32xf32>
    %cst_40 = arith.constant 0.000000e+00 : f32
    %50 = vector.broadcast %cst_40 : f32 to vector<8x32xf32>
    %51 = arith.maximumf %49, %50 : vector<8x32xf32>
    %c0_41 = arith.constant 0 : index
    %c0_42 = arith.constant 0 : index
    %52 = vector.load %arg15[%c0_41, %c0_42] : memref<8x32xf32, #tpu.memory_space<vmem>>, vector<8x32xf32>
    tpu.vector_store %arg15[%c0_41, %c0_42], %51 {strides = array<i32>} : memref<8x32xf32, #tpu.memory_space<vmem>>, vector<8x32xf32>,
    %c1_i32 = arith.constant 1 : i32
    %53 = arith.cmpi eq, %arg0, %c1_i32 : i32
    %54 = arith.extui %53 : i1 to i32
    %c0_i32_43 = arith.constant 0 : i32
    %55 = arith.cmpi ne, %54, %c0_i32_43 : i32
    scf.if %55 {
      %c0_44 = arith.constant 0 : index
      %c0_45 = arith.constant 0 : index
      %56 = vector.load %arg3[%c0_44, %c0_45] : memref<16x32xf32, #tpu.memory_space<vmem>>, vector<16x32xf32>
      %c0_46 = arith.constant 0 : index
      %c0_47 = arith.constant 0 : index
      %57 = vector.load %arg9[%c0_46, %c0_47] : memref<32x32xf32, #tpu.memory_space<vmem>>, vector<32x32xf32>
      %cst_48 = arith.constant dense<0.000000e+00> : vector<16x32xf32>
      %58 = tpu.matmul %56, %57, %cst_48 {dimension_numbers = #tpu.dot_dimension_numbers<[1], [0], [0], [1], [0, 0, 1, 1], [], []>} : vector<16x32xf32>, vector<32x32xf32>, vector<16x32xf32> -> vector<16x32xf32>
      %c0_49 = arith.constant 0 : index
      %c0_50 = arith.constant 0 : index
      %59 = vector.load %arg17[%c0_49, %c0_50] : memref<16x32xf32, #tpu.memory_space<vmem>>, vector<16x32xf32>
      %c0_51 = arith.constant 0 : index
      %c0_52 = arith.constant 0 : index
      %60 = vector.load %arg10[%c0_51, %c0_52] : memref<32x32xf32, #tpu.memory_space<vmem>>, vector<32x32xf32>
      %cst_53 = arith.constant dense<0.000000e+00> : vector<16x32xf32>
      %61 = tpu.matmul %59, %60, %cst_53 {dimension_numbers = #tpu.dot_dimension_numbers<[1], [0], [0], [1], [0, 0, 1, 1], [], []>} : vector<16x32xf32>, vector<32x32xf32>, vector<16x32xf32> -> vector<16x32xf32>
      %62 = arith.addf %58, %61 : vector<16x32xf32>
      %c0_54 = arith.constant 0 : index
      %c0_55 = arith.constant 0 : index
      %63 = vector.load %arg11[%c0_54, %c0_55] : memref<1x32xf32, #tpu.memory_space<vmem>>, vector<1x32xf32>
      %64 = vector.broadcast %63 : vector<1x32xf32> to vector<16x32xf32>
      %65 = arith.addf %62, %64 : vector<16x32xf32>
      %cst_56 = arith.constant 0.000000e+00 : f32
      %66 = vector.broadcast %cst_56 : f32 to vector<16x32xf32>
      %67 = arith.maximumf %65, %66 : vector<16x32xf32>
      %c0_57 = arith.constant 0 : index
      %c0_58 = arith.constant 0 : index
      %68 = vector.load %arg12[%c0_57, %c0_58] : memref<32x32xf32, #tpu.memory_space<vmem>>, vector<32x32xf32>
      %cst_59 = arith.constant dense<0.000000e+00> : vector<16x32xf32>
      %69 = tpu.matmul %67, %68, %cst_59 {dimension_numbers = #tpu.dot_dimension_numbers<[1], [0], [0], [1], [0, 0, 1, 1], [], []>} : vector<16x32xf32>, vector<32x32xf32>, vector<16x32xf32> -> vector<16x32xf32>
      %c0_60 = arith.constant 0 : index
      %c0_61 = arith.constant 0 : index
      %70 = vector.load %arg13[%c0_60, %c0_61] : memref<1x32xf32, #tpu.memory_space<vmem>>, vector<1x32xf32>
      %71 = vector.broadcast %70 : vector<1x32xf32> to vector<16x32xf32>
      %72 = arith.addf %69, %71 : vector<16x32xf32>
      %cst_62 = arith.constant 0.000000e+00 : f32
      %73 = vector.broadcast %cst_62 : f32 to vector<16x32xf32>
      %74 = arith.maximumf %72, %73 : vector<16x32xf32>
      %c0_63 = arith.constant 0 : index
      %c0_64 = arith.constant 0 : index
      %75 = vector.load %arg16[%c0_63, %c0_64] : memref<16x32xf32, #tpu.memory_space<vmem>>, vector<16x32xf32>
      tpu.vector_store %arg16[%c0_63, %c0_64], %74 {strides = array<i32>} : memref<16x32xf32, #tpu.memory_space<vmem>>, vector<16x32xf32>,
    } else {
    }
    return
  }
  func.func @transform_0(%arg0: i32) -> (i32, i32) {
    %c0_i32 = arith.constant 0 : i32
    %c0_i32_0 = arith.constant 0 : i32
    return %arg0, %c0_i32 : i32, i32
  }
  func.func @transform_1(%arg0: i32) -> (i32, i32) {
    %c0_i32 = arith.constant 0 : i32
    %c0_i32_0 = arith.constant 0 : i32
    return %arg0, %c0_i32 : i32, i32
  }
  func.func @transform_2(%arg0: i32) -> (i32, i32) {
    %c0_i32 = arith.constant 0 : i32
    %c0_i32_0 = arith.constant 0 : i32
    %c0_i32_1 = arith.constant 0 : i32
    return %c0_i32, %c0_i32_0 : i32, i32
  }
  func.func @transform_3(%arg0: i32) -> (i32, i32) {
    %c0_i32 = arith.constant 0 : i32
    %c0_i32_0 = arith.constant 0 : i32
    %c0_i32_1 = arith.constant 0 : i32
    return %c0_i32, %c0_i32_0 : i32, i32
  }
  func.func @transform_4(%arg0: i32) -> (i32, i32) {
    %c0_i32 = arith.constant 0 : i32
    %c0_i32_0 = arith.constant 0 : i32
    %c0_i32_1 = arith.constant 0 : i32
    return %c0_i32, %c0_i32_0 : i32, i32
  }
  func.func @transform_5(%arg0: i32) -> (i32, i32) {
    %c0_i32 = arith.constant 0 : i32
    %c0_i32_0 = arith.constant 0 : i32
    %c0_i32_1 = arith.constant 0 : i32
    return %c0_i32, %c0_i32_0 : i32, i32
  }
  func.func @transform_6(%arg0: i32) -> (i32, i32) {
    %c0_i32 = arith.constant 0 : i32
    %c0_i32_0 = arith.constant 0 : i32
    %c0_i32_1 = arith.constant 0 : i32
    return %c0_i32, %c0_i32_0 : i32, i32
  }
  func.func @transform_7(%arg0: i32) -> (i32, i32) {
    %c0_i32 = arith.constant 0 : i32
    %c0_i32_0 = arith.constant 0 : i32
    %c0_i32_1 = arith.constant 0 : i32
    return %c0_i32, %c0_i32_0 : i32, i32
  }
  func.func @transform_8(%arg0: i32) -> (i32, i32) {
    %c0_i32 = arith.constant 0 : i32
    %c0_i32_0 = arith.constant 0 : i32
    %c0_i32_1 = arith.constant 0 : i32
    return %c0_i32, %c0_i32_0 : i32, i32
  }
  func.func @transform_9(%arg0: i32) -> (i32, i32) {
    %c0_i32 = arith.constant 0 : i32
    %c0_i32_0 = arith.constant 0 : i32
    %c0_i32_1 = arith.constant 0 : i32
    return %c0_i32, %c0_i32_0 : i32, i32
  }
  func.func @transform_10(%arg0: i32) -> (i32, i32) {
    %c0_i32 = arith.constant 0 : i32
    %c0_i32_0 = arith.constant 0 : i32
    %c0_i32_1 = arith.constant 0 : i32
    return %c0_i32, %c0_i32_0 : i32, i32
  }
  func.func @transform_11(%arg0: i32) -> (i32, i32) {
    %c0_i32 = arith.constant 0 : i32
    %c0_i32_0 = arith.constant 0 : i32
    %c0_i32_1 = arith.constant 0 : i32
    return %c0_i32, %c0_i32_0 : i32, i32
  }
  func.func @transform_12(%arg0: i32) -> (i32, i32) {
    %c0_i32 = arith.constant 0 : i32
    %c0_i32_0 = arith.constant 0 : i32
    %c0_i32_1 = arith.constant 0 : i32
    return %c0_i32, %c0_i32_0 : i32, i32
  }
  func.func @transform_13(%arg0: i32) -> (i32, i32) {
    %c0_i32 = arith.constant 0 : i32
    %c0_i32_0 = arith.constant 0 : i32
    return %arg0, %c0_i32 : i32, i32
  }
  func.func @transform_14(%arg0: i32) -> (i32, i32) {
    %c0_i32 = arith.constant 0 : i32
    %c0_i32_0 = arith.constant 0 : i32
    return %arg0, %c0_i32 : i32, i32
  }
  func.func @transform_15(%arg0: i32) -> (i32, i32) {
    %c0_i32 = arith.constant 0 : i32
    %c0_i32_0 = arith.constant 0 : i32
    %c0_i32_1 = arith.constant 0 : i32
    return %c0_i32, %c0_i32_0 : i32, i32
  }
}

module attributes {stable_mosaic.version = 11 : i64} {
  func.func @_fused_kernel(%arg0: i32, %arg1: memref<128x64xf32, #tpu.memory_space<vmem>>, %arg2: memref<8x32xf32, #tpu.memory_space<vmem>>, %arg3: memref<16x32xf32, #tpu.memory_space<vmem>>, %arg4: memref<16x32xf32, #tpu.memory_space<vmem>>, %arg5: memref<32x32xf32, #tpu.memory_space<vmem>>, %arg6: memref<64x32xf32, #tpu.memory_space<vmem>>, %arg7: memref<32x32xf32, #tpu.memory_space<vmem>>, %arg8: memref<1x32xf32, #tpu.memory_space<vmem>>, %arg9: memref<32x32xf32, #tpu.memory_space<vmem>>, %arg10: memref<32x32xf32, #tpu.memory_space<vmem>>, %arg11: memref<1x32xf32, #tpu.memory_space<vmem>>, %arg12: memref<32x32xf32, #tpu.memory_space<vmem>>, %arg13: memref<1x32xf32, #tpu.memory_space<vmem>>, %arg14: memref<128x32xf32, #tpu.memory_space<vmem>>, %arg15: memref<8x32xf32, #tpu.memory_space<vmem>>, %arg16: memref<16x32xf32, #tpu.memory_space<vmem>>, %arg17: memref<16x32xf32, #tpu.memory_space<vmem>>) attributes {dimension_semantics = [#tpu.dimension_semantics<arbitrary>], iteration_bounds = array<i64: 2>, scalar_prefetch = 0 : i64, scratch_operands = 1 : i64, tpu.core_type = #tpu.core_type<tc>, window_params = [{transform_indices = @transform_0, window_bounds = array<i64: 128, 64>}, {transform_indices = @transform_1, window_bounds = array<i64: 8, 32>}, {pipeline_mode = #tpu.pipeline_mode<synchronous>, transform_indices = @transform_2, window_bounds = array<i64: 16, 32>}, {pipeline_mode = #tpu.pipeline_mode<synchronous>, transform_indices = @transform_3, window_bounds = array<i64: 16, 32>}, {pipeline_mode = #tpu.pipeline_mode<synchronous>, transform_indices = @transform_4, window_bounds = array<i64: 32, 32>}, {pipeline_mode = #tpu.pipeline_mode<synchronous>, transform_indices = @transform_5, window_bounds = array<i64: 64, 32>}, {pipeline_mode = #tpu.pipeline_mode<synchronous>, transform_indices = @transform_6, window_bounds = array<i64: 32, 32>}, {pipeline_mode = #tpu.pipeline_mode<synchronous>, transform_indices = @transform_7, window_bounds = array<i64: 1, 32>}, {pipeline_mode = #tpu.pipeline_mode<synchronous>, transform_indices = @transform_8, window_bounds = array<i64: 32, 32>}, {pipeline_mode = #tpu.pipeline_mode<synchronous>, transform_indices = @transform_9, window_bounds = array<i64: 32, 32>}, {pipeline_mode = #tpu.pipeline_mode<synchronous>, transform_indices = @transform_10, window_bounds = array<i64: 1, 32>}, {pipeline_mode = #tpu.pipeline_mode<synchronous>, transform_indices = @transform_11, window_bounds = array<i64: 32, 32>}, {pipeline_mode = #tpu.pipeline_mode<synchronous>, transform_indices = @transform_12, window_bounds = array<i64: 1, 32>}, {transform_indices = @transform_13, window_bounds = array<i64: 128, 32>}, {transform_indices = @transform_14, window_bounds = array<i64: 8, 32>}, {pipeline_mode = #tpu.pipeline_mode<synchronous>, transform_indices = @transform_15, window_bounds = array<i64: 16, 32>}]} {
    %c0_i32 = arith.constant 0 : i32
    %0 = arith.cmpi eq, %arg0, %c0_i32 : i32
    %1 = arith.extui %0 : i1 to i32
    %c0_i32_0 = arith.constant 0 : i32
    %2 = arith.cmpi ne, %1, %c0_i32_0 : i32
    scf.if %2 {
      %cst_44 = arith.constant 0.000000e+00 : f32
      %55 = vector.broadcast %cst_44 : f32 to vector<16x32xf32>
      %c0_45 = arith.constant 0 : index
      %c0_46 = arith.constant 0 : index
      %56 = vector.load %arg17[%c0_45, %c0_46] : memref<16x32xf32, #tpu.memory_space<vmem>>, vector<16x32xf32>
      tpu.vector_store %arg17[%c0_45, %c0_46], %55 {strides = array<i32>} : memref<16x32xf32, #tpu.memory_space<vmem>>, vector<16x32xf32>,
    } else {
    }
    %c0 = arith.constant 0 : index
    %c0_1 = arith.constant 0 : index
    %3 = vector.load %arg1[%c0, %c0_1] : memref<128x64xf32, #tpu.memory_space<vmem>>, vector<128x64xf32>
    %c0_2 = arith.constant 0 : index
    %c0_3 = arith.constant 0 : index
    %4 = vector.load %arg2[%c0_2, %c0_3] : memref<8x32xf32, #tpu.memory_space<vmem>>, vector<8x32xf32>
    %c0_4 = arith.constant 0 : index
    %c0_5 = arith.constant 0 : index
    %5 = vector.load %arg5[%c0_4, %c0_5] : memref<32x32xf32, #tpu.memory_space<vmem>>, vector<32x32xf32>
    %cst = arith.constant dense<0.000000e+00> : vector<8x32xf32>
    %6 = tpu.matmul %4, %5, %cst {dimension_numbers = #tpu.dot_dimension_numbers<[1], [0], [0], [1], [0, 0, 1, 1], [], []>} : vector<8x32xf32>, vector<32x32xf32>, vector<8x32xf32> -> vector<8x32xf32>
    %c0_6 = arith.constant 0 : index
    %c0_7 = arith.constant 0 : index
    %7 = vector.load %arg6[%c0_6, %c0_7] : memref<64x32xf32, #tpu.memory_space<vmem>>, vector<64x32xf32>
    %cst_8 = arith.constant dense<0.000000e+00> : vector<128x32xf32>
    %8 = tpu.matmul %3, %7, %cst_8 {dimension_numbers = #tpu.dot_dimension_numbers<[1], [0], [0], [1], [0, 0, 1, 1], [], []>} : vector<128x64xf32>, vector<64x32xf32>, vector<128x32xf32> -> vector<128x32xf32>
    %9 = vector.shape_cast %8 : vector<128x32xf32> to vector<8x16x32xf32>
    %10 = vector.shape_cast %6 : vector<8x32xf32> to vector<8x1x32xf32>
    %11 = vector.broadcast %10 : vector<8x1x32xf32> to vector<8x16x32xf32>
    %12 = arith.addf %9, %11 : vector<8x16x32xf32>
    %c0_9 = arith.constant 0 : index
    %c0_10 = arith.constant 0 : index
    %13 = vector.load %arg4[%c0_9, %c0_10] : memref<16x32xf32, #tpu.memory_space<vmem>>, vector<16x32xf32>
    %14 = vector.shape_cast %13 : vector<16x32xf32> to vector<1x16x32xf32>
    %15 = vector.broadcast %14 : vector<1x16x32xf32> to vector<8x16x32xf32>
    %16 = arith.addf %12, %15 : vector<8x16x32xf32>
    %cst_11 = arith.constant 0.000000e+00 : f32
    %17 = vector.broadcast %cst_11 : f32 to vector<8x16x32xf32>
    %18 = arith.maximumf %16, %17 : vector<8x16x32xf32>
    %19 = vector.shape_cast %18 : vector<8x16x32xf32> to vector<128x32xf32>
    %c0_12 = arith.constant 0 : index
    %c0_13 = arith.constant 0 : index
    %20 = vector.load %arg7[%c0_12, %c0_13] : memref<32x32xf32, #tpu.memory_space<vmem>>, vector<32x32xf32>
    %cst_14 = arith.constant dense<0.000000e+00> : vector<128x32xf32>
    %21 = tpu.matmul %19, %20, %cst_14 {dimension_numbers = #tpu.dot_dimension_numbers<[1], [0], [0], [1], [0, 0, 1, 1], [], []>} : vector<128x32xf32>, vector<32x32xf32>, vector<128x32xf32> -> vector<128x32xf32>
    %c0_15 = arith.constant 0 : index
    %c0_16 = arith.constant 0 : index
    %22 = vector.load %arg8[%c0_15, %c0_16] : memref<1x32xf32, #tpu.memory_space<vmem>>, vector<1x32xf32>
    %23 = vector.broadcast %22 : vector<1x32xf32> to vector<128x32xf32>
    %24 = arith.addf %21, %23 : vector<128x32xf32>
    %cst_17 = arith.constant 0.000000e+00 : f32
    %25 = vector.broadcast %cst_17 : f32 to vector<128x32xf32>
    %26 = arith.maximumf %24, %25 : vector<128x32xf32>
    %27 = vector.shape_cast %26 : vector<128x32xf32> to vector<8x16x32xf32>
    %c0_18 = arith.constant 0 : index
    %c0_19 = arith.constant 0 : index
    %28 = vector.load %arg14[%c0_18, %c0_19] : memref<128x32xf32, #tpu.memory_space<vmem>>, vector<128x32xf32>
    tpu.vector_store %arg14[%c0_18, %c0_19], %26 {strides = array<i32>} : memref<128x32xf32, #tpu.memory_space<vmem>>, vector<128x32xf32>,
    %c0_20 = arith.constant 0 : index
    %c0_21 = arith.constant 0 : index
    %29 = vector.load %arg17[%c0_20, %c0_21] : memref<16x32xf32, #tpu.memory_space<vmem>>, vector<16x32xf32>
    %cst_22 = arith.constant dense<0.000000e+00> : vector<16x32xf32>
    %30 = vector.multi_reduction <add>, %27, %cst_22 [0] : vector<8x16x32xf32> to vector<16x32xf32>
    %31 = arith.addf %29, %30 : vector<16x32xf32>
    %c0_23 = arith.constant 0 : index
    %c0_24 = arith.constant 0 : index
    %32 = vector.load %arg17[%c0_23, %c0_24] : memref<16x32xf32, #tpu.memory_space<vmem>>, vector<16x32xf32>
    tpu.vector_store %arg17[%c0_23, %c0_24], %31 {strides = array<i32>} : memref<16x32xf32, #tpu.memory_space<vmem>>, vector<16x32xf32>,
    %cst_25 = arith.constant dense<0.000000e+00> : vector<8x32xf32>
    %33 = vector.multi_reduction <add>, %27, %cst_25 [1] : vector<8x16x32xf32> to vector<8x32xf32>
    %c0_26 = arith.constant 0 : index
    %c0_27 = arith.constant 0 : index
    %34 = vector.load %arg9[%c0_26, %c0_27] : memref<32x32xf32, #tpu.memory_space<vmem>>, vector<32x32xf32>
    %cst_28 = arith.constant dense<0.000000e+00> : vector<8x32xf32>
    %35 = tpu.matmul %4, %34, %cst_28 {dimension_numbers = #tpu.dot_dimension_numbers<[1], [0], [0], [1], [0, 0, 1, 1], [], []>} : vector<8x32xf32>, vector<32x32xf32>, vector<8x32xf32> -> vector<8x32xf32>
    %c0_29 = arith.constant 0 : index
    %c0_30 = arith.constant 0 : index
    %36 = vector.load %arg10[%c0_29, %c0_30] : memref<32x32xf32, #tpu.memory_space<vmem>>, vector<32x32xf32>
    %cst_31 = arith.constant dense<0.000000e+00> : vector<8x32xf32>
    %37 = tpu.matmul %33, %36, %cst_31 {dimension_numbers = #tpu.dot_dimension_numbers<[1], [0], [0], [1], [0, 0, 1, 1], [], []>} : vector<8x32xf32>, vector<32x32xf32>, vector<8x32xf32> -> vector<8x32xf32>
    %38 = arith.addf %35, %37 : vector<8x32xf32>
    %c0_32 = arith.constant 0 : index
    %c0_33 = arith.constant 0 : index
    %39 = vector.load %arg11[%c0_32, %c0_33] : memref<1x32xf32, #tpu.memory_space<vmem>>, vector<1x32xf32>
    %40 = vector.broadcast %39 : vector<1x32xf32> to vector<8x32xf32>
    %41 = arith.addf %38, %40 : vector<8x32xf32>
    %cst_34 = arith.constant 0.000000e+00 : f32
    %42 = vector.broadcast %cst_34 : f32 to vector<8x32xf32>
    %43 = arith.maximumf %41, %42 : vector<8x32xf32>
    %c0_35 = arith.constant 0 : index
    %c0_36 = arith.constant 0 : index
    %44 = vector.load %arg12[%c0_35, %c0_36] : memref<32x32xf32, #tpu.memory_space<vmem>>, vector<32x32xf32>
    %cst_37 = arith.constant dense<0.000000e+00> : vector<8x32xf32>
    %45 = tpu.matmul %43, %44, %cst_37 {dimension_numbers = #tpu.dot_dimension_numbers<[1], [0], [0], [1], [0, 0, 1, 1], [], []>} : vector<8x32xf32>, vector<32x32xf32>, vector<8x32xf32> -> vector<8x32xf32>
    %c0_38 = arith.constant 0 : index
    %c0_39 = arith.constant 0 : index
    %46 = vector.load %arg13[%c0_38, %c0_39] : memref<1x32xf32, #tpu.memory_space<vmem>>, vector<1x32xf32>
    %47 = vector.broadcast %46 : vector<1x32xf32> to vector<8x32xf32>
    %48 = arith.addf %45, %47 : vector<8x32xf32>
    %cst_40 = arith.constant 0.000000e+00 : f32
    %49 = vector.broadcast %cst_40 : f32 to vector<8x32xf32>
    %50 = arith.maximumf %48, %49 : vector<8x32xf32>
    %c0_41 = arith.constant 0 : index
    %c0_42 = arith.constant 0 : index
    %51 = vector.load %arg15[%c0_41, %c0_42] : memref<8x32xf32, #tpu.memory_space<vmem>>, vector<8x32xf32>
    tpu.vector_store %arg15[%c0_41, %c0_42], %50 {strides = array<i32>} : memref<8x32xf32, #tpu.memory_space<vmem>>, vector<8x32xf32>,
    %c1_i32 = arith.constant 1 : i32
    %52 = arith.cmpi eq, %arg0, %c1_i32 : i32
    %53 = arith.extui %52 : i1 to i32
    %c0_i32_43 = arith.constant 0 : i32
    %54 = arith.cmpi ne, %53, %c0_i32_43 : i32
    scf.if %54 {
      %c0_44 = arith.constant 0 : index
      %c0_45 = arith.constant 0 : index
      %55 = vector.load %arg3[%c0_44, %c0_45] : memref<16x32xf32, #tpu.memory_space<vmem>>, vector<16x32xf32>
      %c0_46 = arith.constant 0 : index
      %c0_47 = arith.constant 0 : index
      %56 = vector.load %arg9[%c0_46, %c0_47] : memref<32x32xf32, #tpu.memory_space<vmem>>, vector<32x32xf32>
      %cst_48 = arith.constant dense<0.000000e+00> : vector<16x32xf32>
      %57 = tpu.matmul %55, %56, %cst_48 {dimension_numbers = #tpu.dot_dimension_numbers<[1], [0], [0], [1], [0, 0, 1, 1], [], []>} : vector<16x32xf32>, vector<32x32xf32>, vector<16x32xf32> -> vector<16x32xf32>
      %c0_49 = arith.constant 0 : index
      %c0_50 = arith.constant 0 : index
      %58 = vector.load %arg17[%c0_49, %c0_50] : memref<16x32xf32, #tpu.memory_space<vmem>>, vector<16x32xf32>
      %c0_51 = arith.constant 0 : index
      %c0_52 = arith.constant 0 : index
      %59 = vector.load %arg10[%c0_51, %c0_52] : memref<32x32xf32, #tpu.memory_space<vmem>>, vector<32x32xf32>
      %cst_53 = arith.constant dense<0.000000e+00> : vector<16x32xf32>
      %60 = tpu.matmul %58, %59, %cst_53 {dimension_numbers = #tpu.dot_dimension_numbers<[1], [0], [0], [1], [0, 0, 1, 1], [], []>} : vector<16x32xf32>, vector<32x32xf32>, vector<16x32xf32> -> vector<16x32xf32>
      %61 = arith.addf %57, %60 : vector<16x32xf32>
      %c0_54 = arith.constant 0 : index
      %c0_55 = arith.constant 0 : index
      %62 = vector.load %arg11[%c0_54, %c0_55] : memref<1x32xf32, #tpu.memory_space<vmem>>, vector<1x32xf32>
      %63 = vector.broadcast %62 : vector<1x32xf32> to vector<16x32xf32>
      %64 = arith.addf %61, %63 : vector<16x32xf32>
      %cst_56 = arith.constant 0.000000e+00 : f32
      %65 = vector.broadcast %cst_56 : f32 to vector<16x32xf32>
      %66 = arith.maximumf %64, %65 : vector<16x32xf32>
      %c0_57 = arith.constant 0 : index
      %c0_58 = arith.constant 0 : index
      %67 = vector.load %arg12[%c0_57, %c0_58] : memref<32x32xf32, #tpu.memory_space<vmem>>, vector<32x32xf32>
      %cst_59 = arith.constant dense<0.000000e+00> : vector<16x32xf32>
      %68 = tpu.matmul %66, %67, %cst_59 {dimension_numbers = #tpu.dot_dimension_numbers<[1], [0], [0], [1], [0, 0, 1, 1], [], []>} : vector<16x32xf32>, vector<32x32xf32>, vector<16x32xf32> -> vector<16x32xf32>
      %c0_60 = arith.constant 0 : index
      %c0_61 = arith.constant 0 : index
      %69 = vector.load %arg13[%c0_60, %c0_61] : memref<1x32xf32, #tpu.memory_space<vmem>>, vector<1x32xf32>
      %70 = vector.broadcast %69 : vector<1x32xf32> to vector<16x32xf32>
      %71 = arith.addf %68, %70 : vector<16x32xf32>
      %cst_62 = arith.constant 0.000000e+00 : f32
      %72 = vector.broadcast %cst_62 : f32 to vector<16x32xf32>
      %73 = arith.maximumf %71, %72 : vector<16x32xf32>
      %c0_63 = arith.constant 0 : index
      %c0_64 = arith.constant 0 : index
      %74 = vector.load %arg16[%c0_63, %c0_64] : memref<16x32xf32, #tpu.memory_space<vmem>>, vector<16x32xf32>
      tpu.vector_store %arg16[%c0_63, %c0_64], %73 {strides = array<i32>} : memref<16x32xf32, #tpu.memory_space<vmem>>, vector<16x32xf32>,
    } else {
    }
    return
  }
  func.func @transform_0(%arg0: i32) -> (i32, i32) {
    %c0_i32 = arith.constant 0 : i32
    %c0_i32_0 = arith.constant 0 : i32
    return %arg0, %c0_i32 : i32, i32
  }
  func.func @transform_1(%arg0: i32) -> (i32, i32) {
    %c0_i32 = arith.constant 0 : i32
    %c0_i32_0 = arith.constant 0 : i32
    return %arg0, %c0_i32 : i32, i32
  }
  func.func @transform_2(%arg0: i32) -> (i32, i32) {
    %c0_i32 = arith.constant 0 : i32
    %c0_i32_0 = arith.constant 0 : i32
    %c0_i32_1 = arith.constant 0 : i32
    return %c0_i32, %c0_i32_0 : i32, i32
  }
  func.func @transform_3(%arg0: i32) -> (i32, i32) {
    %c0_i32 = arith.constant 0 : i32
    %c0_i32_0 = arith.constant 0 : i32
    %c0_i32_1 = arith.constant 0 : i32
    return %c0_i32, %c0_i32_0 : i32, i32
  }
  func.func @transform_4(%arg0: i32) -> (i32, i32) {
    %c0_i32 = arith.constant 0 : i32
    %c0_i32_0 = arith.constant 0 : i32
    %c0_i32_1 = arith.constant 0 : i32
    return %c0_i32, %c0_i32_0 : i32, i32
  }
  func.func @transform_5(%arg0: i32) -> (i32, i32) {
    %c0_i32 = arith.constant 0 : i32
    %c0_i32_0 = arith.constant 0 : i32
    %c0_i32_1 = arith.constant 0 : i32
    return %c0_i32, %c0_i32_0 : i32, i32
  }
  func.func @transform_6(%arg0: i32) -> (i32, i32) {
    %c0_i32 = arith.constant 0 : i32
    %c0_i32_0 = arith.constant 0 : i32
    %c0_i32_1 = arith.constant 0 : i32
    return %c0_i32, %c0_i32_0 : i32, i32
  }
  func.func @transform_7(%arg0: i32) -> (i32, i32) {
    %c0_i32 = arith.constant 0 : i32
    %c0_i32_0 = arith.constant 0 : i32
    %c0_i32_1 = arith.constant 0 : i32
    return %c0_i32, %c0_i32_0 : i32, i32
  }
  func.func @transform_8(%arg0: i32) -> (i32, i32) {
    %c0_i32 = arith.constant 0 : i32
    %c0_i32_0 = arith.constant 0 : i32
    %c0_i32_1 = arith.constant 0 : i32
    return %c0_i32, %c0_i32_0 : i32, i32
  }
  func.func @transform_9(%arg0: i32) -> (i32, i32) {
    %c0_i32 = arith.constant 0 : i32
    %c0_i32_0 = arith.constant 0 : i32
    %c0_i32_1 = arith.constant 0 : i32
    return %c0_i32, %c0_i32_0 : i32, i32
  }
  func.func @transform_10(%arg0: i32) -> (i32, i32) {
    %c0_i32 = arith.constant 0 : i32
    %c0_i32_0 = arith.constant 0 : i32
    %c0_i32_1 = arith.constant 0 : i32
    return %c0_i32, %c0_i32_0 : i32, i32
  }
  func.func @transform_11(%arg0: i32) -> (i32, i32) {
    %c0_i32 = arith.constant 0 : i32
    %c0_i32_0 = arith.constant 0 : i32
    %c0_i32_1 = arith.constant 0 : i32
    return %c0_i32, %c0_i32_0 : i32, i32
  }
  func.func @transform_12(%arg0: i32) -> (i32, i32) {
    %c0_i32 = arith.constant 0 : i32
    %c0_i32_0 = arith.constant 0 : i32
    %c0_i32_1 = arith.constant 0 : i32
    return %c0_i32, %c0_i32_0 : i32, i32
  }
  func.func @transform_13(%arg0: i32) -> (i32, i32) {
    %c0_i32 = arith.constant 0 : i32
    %c0_i32_0 = arith.constant 0 : i32
    return %arg0, %c0_i32 : i32, i32
  }
  func.func @transform_14(%arg0: i32) -> (i32, i32) {
    %c0_i32 = arith.constant 0 : i32
    %c0_i32_0 = arith.constant 0 : i32
    return %arg0, %c0_i32 : i32, i32
  }
  func.func @transform_15(%arg0: i32) -> (i32, i32) {
    %c0_i32 = arith.constant 0 : i32
    %c0_i32_0 = arith.constant 0 : i32
    %c0_i32_1 = arith.constant 0 : i32
    return %c0_i32, %c0_i32_0 : i32, i32
  }
}

</mosaic_0001>

<bundles_post_ra>
// kernel: tpu_custom_call.1
= control target key start
LH: loop header
LB: loop body
LE: loop exit
PB: predicated region body
PF: predicated region fallthrough
CT: control target
= control target key end

     0   :  { %s2982_s0 = inlined_call_operand.vmem [shape: f32[256,64], index: 0, kind: input, shape index: {}]   ;;  %s2983_s1 = inlined_call_operand.vmem [shape: f32[16,32], index: 1, kind: input, shape index: {}]   ;;  %s2984_s2 = inlined_call_operand.vmem [shape: f32[16,32], index: 2, kind: input, shape index: {}]   ;;  %s2985_s3 = inlined_call_operand.vmem [shape: f32[16,32], index: 3, kind: input, shape index: {}]   ;;  %s2986_s4 = inlined_call_operand.vmem [shape: f32[32,32], index: 4, kind: input, shape index: {}]   ;;  %s2987_s5 = inlined_call_operand.vmem [shape: f32[64,32], index: 5, kind: input, shape index: {}]   ;;  %s2988_s6 = inlined_call_operand.vmem [shape: f32[32,32], index: 6, kind: input, shape index: {}]   ;;  %s2989_s7 = inlined_call_operand.vmem [shape: f32[1,32], index: 7, kind: input, shape index: {}]   ;;  %s2990_s8 = inlined_call_operand.vmem [shape: f32[32,32], index: 8, kind: input, shape index: {}]   ;;  %s2991_s9 = inlined_call_operand.vmem [shape: f32[32,32], index: 9, kind: input, shape index: {}]   ;;  %s2992_s10 = inlined_call_operand.vmem [shape: f32[1,32], index: 10, kind: input, shape index: {}]   ;;  %s2993_s11 = inlined_call_operand.vmem [shape: f32[32,32], index: 11, kind: input, shape index: {}]   ;;  %s2994_s12 = inlined_call_operand.vmem [shape: f32[1,32], index: 12, kind: input, shape index: {}]   ;;  %s2995_s13 = inlined_call_operand.vmem [shape: f32[256,32], index: 13, kind: output, shape index: {0}]   ;;  %s2996_s14 = inlined_call_operand.hbm [shape: f32[16,32], index: 14, kind: output, shape index: {1}]   ;;  %s2997_s15 = inlined_call_operand.hbm [shape: f32[16,32], index: 15, kind: output, shape index: {2}]  }
   0x1   :  { %3009 = sst [smem:[#allocation16_spill]] %s2996_s14 }
   0x2   :  { %3010 = sst [smem:[#allocation17_spill]] %s2997_s15 }
   0x3   :  { %21 = vsyncpa [#allocation4], 0 }
   0x4   :  { %23 = vsyncpa [#allocation4 + $0x1], 0 }
   0x5   :  { %24 = vsyncpa [#allocation6], 0  ;;  %s2517_s18 = smov 0   ;;  %s2519_s19 = smov 0  }
   0x6   :  { %s2521_s20 = smov 0   ;;  %s2523_s21 = smov 0  }
   0x7 LB: > { %3011 = sst [smem:[#allocation9_spill]] %s2415_s18  ;;  %s2538_s22 = sadd.s32 4294967295, %s2427_s21   ;;  %s2427_s21 = sphi %s2523_s21, %s3032_s21   ;;  %s2423_s20 = sphi %s2521_s20, %s3034_s20   ;;  %s2419_s19 = sphi %s2519_s19, %s3036_s19   ;;  %s2415_s18 = sphi %s2517_s18, %s3035_s18  }
   0x8   : > { %3012 = sst [smem:[#allocation10_spill]] %s2423_s20  ;;  %s1991_s23 = sadd.s32 4294967294, %s2427_s21  }
   0x9   : > { %3013 = sst [smem:[#allocation11_spill]] %s2427_s21  ;;  %s2542_s24 = sadd.s32 1, %s2427_s21  }
   0xa   : > { %3014 = sst [smem:[#allocation12_spill]] %s2542_s24  ;;  %s346_s25 = sadd.s32 1, %s2423_s20 }
   0xb   : > { %s343_s26 = ssub.s32 %s2427_s21, %s2542_s24  ;;  %p356_p0 = scmp.ne.s32.totalorder %s2423_s20, %s2419_s19 }
   0xc   : > { %p344_p1 = scmp.eq.s32.totalorder %s343_s26, 0  ;;  %p3008_p2 = scmp.eq.s32.totalorder %s2538_s22, 1 }
   0xd   : > { %p362_p3 = scmp.ne.s32.totalorder %s2419_s19, %s2415_s18  ;;  %p363_p4 = scmp.eq.s32.totalorder %s1991_s23, 1 }
   0xe   : > { %s2553_s27 = scalar_select %p344_p1, %s2423_s20, %s346_s25  }
   0xf   : > { %p2557_p5 = por %p3008_p2, %p356_p0  ;;  %p2561_p6 = por %p363_p4, %p362_p3 }
  0x10   : > { %3015 = sst [smem:[#allocation13_spill]] %s2553_s27  ;;  %p1994_p7 = scmp.ge.s32.totalorder %s2427_s21, 1 }
  0x11   : > { %s3016_s28 = scalar_select %p2557_p5, 1, 0 }
  0x12   : > { %s3018_s29 = scalar_select %p2561_p6, 1, 0 }
  0x13   : > { %3017 = sst [smem:[#allocation14_spill]] %s3016_s28  ;;  %p451_p8 = scmp.lt.s32.totalorder %s2427_s21, 3 }
  0x14   : > { %3019 = sst [smem:[#allocation15_spill]] %s3018_s29 }
  0x15   : > { %p452_p9 = pnand %p1994_p7, %p451_p8 }
  0x16   : > { %s3004_s30 = sand.u32 (!%p452_p9), 1, %s2419_s19   ;;  %s1996_s16 = sshll.u32 (!%p452_p9), %s2538_s22, 4 }
  0x17   : > { %455 = sbr.rel (%p452_p9) target bundleno = 1356 (0x54c), region = 72  ;;  %s2571_s17 = sshll.u32 (!%p452_p9), %s3004_s30, 3 }
  0x18   : > { %p509_p10 = scmp.lt.s32.totalorder (!%p452_p9), %s1996_s16, 31  ;;  %p514_p11 = scmp.lt.s32.totalorder (!%p452_p9), %s2538_s22, 1 }
  0x19   : > { %s505_s28 = scalar_lea.vmem (!%p452_p9), [#allocation3], %s2571_s17  ;;  %p2001_p12 = scmp.ne.s32.totalorder (!%p452_p9), %s2538_s22, 0 }
  0x1c   : > { %s3038_s16 = smov (!%p509_p10, %s1996_s16), 31  ;;  %527 = sbr.rel (%p2001_p12) target bundleno = 35 (0x23), region = 76 }
  0x1d   : > { %s515_s23 = scalar_select %p514_p11, %s2538_s22, 1 }
  0x1e   : > { %s1997_s25 = sshll.u32 %s3038_s16, 3 }
  0x1f   : > { %s2578_s20 = scalar_lea.vmem %s2982_s0, %s1997_s25  ;;  %s1998_s24 = sshll.u32 %s515_s23, 3 }
  0x20   : > { %s2583_s21 = scalar_lea.vmem %s2983_s1, %s1998_s24  ;;  %s2588_s14 = scalar_lea.vmem %s2995_s13, %s1997_s25 }
  0x21   : > { %vm528_vm0 = vcmask 261120   ;;  %v2429_v0 = vmov 0.0  }
  0x22   : > { %529 = vst.msk [vmem:[#allocation2] sm:$0xff] %vm528_vm0, %v2429_v0  ;;  %530 = vst.msk [vmem:[#allocation2 + $0x8] sm:$0xff] %vm528_vm0, %v2429_v0 }
  0x23 PF: > { %v633_v1 = vld [vmem:[%s2987_s5 + $0x38] sm:$0xff]  ;;  %v632_v2 = vld [vmem:[%s2987_s5 + $0x30] sm:$0xff]  ;;  %v2430_v4 = vmov 0.0   ;;  %v631_v6 = vld [vmem:[%s2987_s5 + $0x28] sm:$0xff]  ;;  %vm552_vm1 = vcmask 261120   ;;  %vm634_vm2 = vcmask 523264   ;;  %v833_v37 = vlaneseq }
  0x24   : > { %v551_v3 = vld [vmem:[%s2986_s4 + $0x18] sm:$0xff]  ;;  %2149 = vmatprep.subr.mxu1 %v633_v1  ;;  %2138 = vmatprep.subr.mxu0 %v2430_v4  ;;  %v550_v5 = vld [vmem:[%s2986_s4 + $0x10] sm:$0xff]  ;;  %v549_v7 = vld [vmem:[%s2986_s4 + $0x8] sm:$0xff]  ;;  %vm2431_vm3 = vmmov 0   ;;  %v2432_v35 = vmov 1966171168  }
  0x25   : > { %2150 = vmatpush3.msra.mxu1 %v633_v1  ;;  %2139 = vmatpush3.msra.mxu0 %v551_v3  ;;  %v630_v8 = vld [vmem:[%s2987_s5 + $0x20] sm:$0xff]  ;;  %v629_v10 = vld [vmem:[%s2987_s5 + $0x18] sm:$0xff]  ;;  %v628_v12 = vld [vmem:[%s2987_s5 + $0x10] sm:$0xff]  ;;  %v831_v36 = vunpack.c.l.s4 %v2432_v35  ;;  %v834_v39 = vshrl.u32 %v833_v37, 7  ;;  %vm1312_vm4 = vcmask 1041409   ;;  %vm1314_vm5 = vcmask 1042434  }
  0x26   : > { %2151 = vmatprep.subr.mxu1 %v632_v2  ;;  %2140 = vmatprep.subr.mxu0 %v2430_v4  ;;  %v548_v9 = vld [vmem:[%s2986_s4] sm:$0xff]  ;;  %v627_v14 = vld [vmem:[%s2987_s5 + $0x8] sm:$0xff]  ;;  %v533_v17 = vld [vmem:[%s2578_s20 + $0x10] sm:$0xff]  ;;  %vm1316_vm6 = vcmask 1043459   ;;  %vm1318_vm7 = vcmask 1044484   ;;  %vm1320_vm8 = vcmask 1045509  }
  0x27   : > { %2152 = vmatpush3.msra.mxu1 %v632_v2  ;;  %2141 = vmatpush3.msra.mxu0 %v550_v5  ;;  %v2624_v11 = vld [vmem:[%s2583_s21] sm:$0xff]  ;;  %v532_v16 = vld [vmem:[%s2578_s20 + $0x8] sm:$0xff]  ;;  %v534_v18 = vld [vmem:[%s2578_s20 + $0x18] sm:$0xff]  ;;  %v832_v38 = vunpack.c.0.s8 %v831_v36  ;;  %v2687_v43 = vsub.s32 0, %v834_v39  ;;  %vm1322_vm9 = vcmask 1046534   ;;  %vm1324_vm10 = vcmask 1047559  }
  0x28   : > { %2153 = vmatprep.subr.mxu1 %v631_v6  ;;  %2142 = vmatprep.subr.mxu0 %v2430_v4  ;;  %v531_v13 = vld [vmem:[%s2578_s20] sm:$0xff]  ;;  %v536_v20 = vld [vmem:[%s2578_s20 + $0x28] sm:$0xff]  ;;  %v537_v21 = vld [vmem:[%s2578_s20 + $0x30] sm:$0xff]  ;;  %p2041_p13 = scmp.ne.s32.totalorder %s2538_s22, 1 }
  0x29   : > { %2154 = vmatpush3.msra.mxu1 %v631_v6  ;;  %2143 = vmatpush3.msra.mxu0 %v549_v7  ;;  %v626_v15 = vld [vmem:[%s2987_s5] sm:$0xff]  ;;  %v538_v22 = vld [vmem:[%s2578_s20 + $0x38] sm:$0xff]  ;;  %v540_v24 = vld [vmem:[%s2578_s20 + $0x48] sm:$0xff]  ;;  %v835_v40 = vsub.s32 %v832_v38, %v834_v39 }
  0x2a   : > { %2155 = vmatprep.subr.mxu1 %v630_v8  ;;  %2144 = vmatprep.subr.mxu0 %v2430_v4  ;;  %v535_v19 = vld [vmem:[%s2578_s20 + $0x20] sm:$0xff]  ;;  %v541_v25 = vld [vmem:[%s2578_s20 + $0x50] sm:$0xff]  ;;  %v542_v26 = vld [vmem:[%s2578_s20 + $0x58] sm:$0xff] }
  0x2b   : > { %2156 = vmatpush3.msra.mxu1 %v630_v8  ;;  %2145 = vmatpush3.msra.mxu0 %v548_v9  ;;  %v539_v23 = vld [vmem:[%s2578_s20 + $0x40] sm:$0xff]  ;;  %v544_v28 = vld [vmem:[%s2578_s20 + $0x68] sm:$0xff]  ;;  %v545_v29 = vld [vmem:[%s2578_s20 + $0x70] sm:$0xff] }
  0x2c   : > { %2157 = vmatprep.subr.mxu1 %v629_v10  ;;  %2146 = vmatprep.mubr.msk.f32.mxu0 %vm2431_vm3, %v2430_v4  ;;  %v543_v27 = vld [vmem:[%s2578_s20 + $0x60] sm:$0xff]  ;;  %v546_v30 = vld [vmem:[%s2578_s20 + $0x78] sm:$0xff]  ;;  %v970_v32 = vld [vmem:[%s2988_s6 + $0x10] sm:$0xff] }
  0x2d   : > { %2158 = vmatpush3.msra.mxu1 %v629_v10  ;;  %2147 = vmatmul.mubr.msk.f32.vlgmr.msra.gmra.mxu0 %vm552_vm1, %v2624_v11  ;;  %v971_v31 = vld [vmem:[%s2988_s6 + $0x18] sm:$0xff]  ;;  %v969_v33 = vld [vmem:[%s2988_s6 + $0x8] sm:$0xff]  ;;  %v968_v34 = vld [vmem:[%s2988_s6] sm:$0xff] }
  0x2e   : > { %2159 = vmatprep.subr.mxu1 %v628_v12  ;;  %2165 = vmatprep.mubr.msk.f32.mxu1 %vm634_vm2, %v531_v13  ;;  %v2693_v51 = vld [vmem:[%s2985_s3 + $0x8] sm:$0xff]  ;;  %v2699_v55 = vld [vmem:[%s2985_s3] sm:$0xff] }
  0x2f   : > { %2160 = vmatpush3.msra.mxu1 %v628_v12  ;;  %2189 = vmatprep.subr.mxu0 %v971_v31 }
  0x30   : > { %2161 = vmatprep.subr.mxu1 %v627_v14  ;;  %2190 = vmatpush3.msra.mxu0 %v971_v31 }
  0x31   : > { %2162 = vmatpush3.msra.mxu1 %v627_v14  ;;  %2191 = vmatprep.subr.mxu0 %v970_v32 }
  0x32   : > { %2163 = vmatprep.subr.mxu1 %v626_v15  ;;  %2192 = vmatpush3.msra.mxu0 %v970_v32 }
  0x33   : > { %2164 = vmatpush3.msra.mxu1 %v626_v15  ;;  %2193 = vmatprep.subr.mxu0 %v969_v33 }
  0x34   : > { %2166 = vmatmul.mubr.msk.f32.vlgmr.msra.gmra.mxu1 %vm634_vm2, %v532_v16  ;;  %2232 = vmatprep.subr.mxu1 %v2430_v4 }
  0x35   : > { %2168 = vmatprep.mubr.msk.f32.mxu1 %vm634_vm2, %v533_v17  ;;  %2194 = vmatpush3.msra.mxu0 %v969_v33 }
  0x36   : > { %2195 = vmatprep.subr.mxu0 %v968_v34 }
  0x37   : > { %2196 = vmatpush3.msra.mxu0 %v968_v34 }
  0x38   : > { %2169 = vmatmul.mubr.msk.f32.gmra.mxu1 %vm634_vm2, %v534_v18  ;;  %2221 = vmatprep.subr.mxu0 %v2430_v4 }
  0x39   : > { %2171 = vmatprep.mubr.msk.f32.mxu1 %vm634_vm2, %v535_v19 }
  0x3c   : > { %2172 = vmatmul.mubr.msk.f32.gmra.mxu1 %vm634_vm2, %v536_v20 }
  0x3d   : > { %2174 = vmatprep.mubr.msk.f32.mxu1 %vm634_vm2, %v537_v21 }
  0x40   : > { %2175 = vmatmul.mubr.msk.f32.gmra.mxu1 %vm634_vm2, %v538_v22 }
  0x41   : > { %2177 = vmatprep.mubr.msk.f32.mxu1 %vm634_vm2, %v539_v23 }
  0x44   : > { %2178 = vmatmul.mubr.msk.f32.gmra.mxu1 %vm634_vm2, %v540_v24 }
  0x45   : > { %2180 = vmatprep.mubr.msk.f32.mxu1 %vm634_vm2, %v541_v25 }
  0x48   : > { %2181 = vmatmul.mubr.msk.f32.gmra.mxu1 %vm634_vm2, %v542_v26 }
  0x49   : > { %2183 = vmatprep.mubr.msk.f32.mxu1 %vm634_vm2, %v543_v27 }
  0x4c   : > { %2184 = vmatmul.mubr.msk.f32.gmra.mxu1 %vm634_vm2, %v544_v28 }
  0x4d   : > { %2186 = vmatprep.mubr.msk.f32.mxu1 %vm634_vm2, %v545_v29 }
  0x50   : > { %2187 = vmatmul.mubr.msk.f32.gmra.mxu1 %vm634_vm2, %v546_v30 }
  0x51   : > { %2240 = vmatprep.mubr.msk.f32.mxu1 %vm2431_vm3, %v2430_v4 }
  0xed   : > { %v622_v41 = vpop.f32.mrf.mxu0 }
  0xee   : > { %v836_v42 = vrot.slane %v622_v41, %v835_v40  ;;  %v829_v53 = vcombine.high %v622_v41, %v622_v41 }
  0xef   : > { %v2148_v44 = vpop.f32.mrf.mxu0 }
  0xf0   : > { %v844_v45 = vcombine.high %v836_v42, %v836_v42  ;;  %v852_v46 = vrot.slane %v836_v42, %v835_v40  ;;  %v843_v62 = vrot.slane %v829_v53, %v835_v40 }
  0xf2   : > { %v881_v47 = vrot.slane %v852_v46, %v2687_v43  ;;  %v866_v48 = vrot.slane %v844_v45, %v835_v40  ;;  %v874_v57 = vcombine.high %v852_v46, %v852_v46  ;;  %v845_v10 = vcombine.high %v843_v62, %v843_v62 }
  0xf3   : > { %v859_v16 = vrot.slane %v843_v62, %v835_v40 }
  0xf4   : > { %v2167_v49 = vpop.f32.mrf.mxu1  ;;  %v885_v52 = vrot.slane %v866_v48, %v2687_v43  ;;  %v889_v2 = vrot.slane %v874_v57, %v2687_v43  ;;  %v876_v3 = vcombine.high %v866_v48, %v866_v48  ;;  %v873_v26 = vrot.slane %v845_v10, %v835_v40  ;;  %v1297_v10 = vld [vmem:[%s2990_s8 + $0x8] sm:$0xff] }
  0xf5   : > { %v919_v50 = vadd.f32 %v2167_v49, %v881_v47  ;;  %v897_v25 = vrot.slane %v859_v16, %v2687_v43  ;;  %v875_v36 = vcombine.high %v859_v16, %v859_v16 }
  0xf6   : > { %v749_v54 = vpop.f32.mrf.mxu1  ;;  %v893_v15 = vrot.slane %v876_v3, %v2687_v43  ;;  %v901_v35 = vrot.slane %v873_v26, %v2687_v43 }
  0xf7   : > { %v918_v56 = vadd.f32 %v881_v47, %v749_v54  ;;  %v937_v58 = vadd.f32 %v2693_v51, %v919_v50  ;;  %v905_v46 = vrot.slane %v875_v36, %v2687_v43  ;;  %v877_v47 = vcombine.high %v873_v26, %v873_v26 }
  0xf8   : > { %v2170_v59 = vpop.f32.mrf.mxu1 }
  0xf9   : > { %v936_v60 = vadd.f32 %v2699_v55, %v918_v56  ;;  %v921_v61 = vadd.f32 %v2170_v59, %v885_v52  ;;  %v953_v5 = vmax.f32 %v937_v58, 0.0  ;;  %v909_v58 = vrot.slane %v877_v47, %v2687_v43 }
  0xfa   : > { %v759_v63 = vpop.f32.mrf.mxu1 }
  0xfb   : > { %v952_v0 = vmax.f32 %v936_v60, 0.0  ;;  %v920_v1 = vadd.f32 %v885_v52, %v759_v63  ;;  %v939_v6 = vadd.f32 %v2693_v51, %v921_v61 }
  0xfc   : > { %v2173_v7 = vpop.f32.mrf.mxu1 }
  0xfd   : > { %v938_v8 = vadd.f32 %v2699_v55, %v920_v1  ;;  %v923_v9 = vadd.f32 %v2173_v7, %v889_v2  ;;  %2197 = vmatprep.mubr.msk.f32.mxu0 %vm552_vm1, %v952_v0  ;;  %v955_v17 = vmax.f32 %v939_v6, 0.0 }
  0xfe   : > { %v769_v12 = vpop.f32.mrf.mxu1  ;;  %2198 = vmatmul.mubr.msk.f32.vlgmr.msra.gmra.mxu0 %vm552_vm1, %v953_v5 }
  0xff   : > { %v954_v13 = vmax.f32 %v938_v8, 0.0  ;;  %v922_v14 = vadd.f32 %v889_v2, %v769_v12  ;;  %v941_v18 = vadd.f32 %v2693_v51, %v923_v9  ;;  %v1303_v8 = vld [vmem:[%s2991_s9 + $0x18] sm:$0xff]  ;;  %v1298_v9 = vld [vmem:[%s2990_s8 + $0x10] sm:$0xff]  ;;  %v1301_v12 = vld [vmem:[%s2991_s9 + $0x8] sm:$0xff] }
 0x100   : > { %v2176_v19 = vpop.f32.mrf.mxu1  ;;  %2222 = vmatpush3.msra.mxu0 %v1303_v8 }
 0x101   : > { %v940_v20 = vadd.f32 %v2699_v55, %v922_v14  ;;  %v925_v21 = vadd.f32 %v2176_v19, %v893_v15  ;;  %2200 = vmatprep.mubr.msk.f32.mxu0 %vm552_vm1, %v954_v13  ;;  %v957_v27 = vmax.f32 %v941_v18, 0.0  ;;  %2223 = vmatprep.subr.mxu0 %v2430_v4  ;;  %v1296_v13 = vld [vmem:[%s2990_s8] sm:$0xff] }
 0x102   : > { %v779_v22 = vpop.f32.mrf.mxu1  ;;  %2201 = vmatmul.mubr.msk.f32.gmra.mxu0 %vm552_vm1, %v955_v17  ;;  %v1300_v14 = vld [vmem:[%s2991_s9] sm:$0xff] }
 0x103   : > { %v956_v23 = vmax.f32 %v940_v20, 0.0  ;;  %v924_v24 = vadd.f32 %v893_v15, %v779_v22  ;;  %v943_v28 = vadd.f32 %v2693_v51, %v925_v21  ;;  %v2777_v15 = vld [vmem:[%s2989_s7] ss:$0 sm:$0xff] }
 0x104   : > { %v2179_v29 = vpop.f32.mrf.mxu1 }
 0x105   : > { %v942_v30 = vadd.f32 %v2699_v55, %v924_v24  ;;  %v927_v31 = vadd.f32 %v2179_v29, %v897_v25  ;;  %2203 = vmatprep.mubr.msk.f32.mxu0 %vm552_vm1, %v956_v23  ;;  %v959_v37 = vmax.f32 %v943_v28, 0.0 }
 0x106   : > { %v789_v32 = vpop.f32.mrf.mxu1  ;;  %2204 = vmatmul.mubr.msk.f32.gmra.mxu0 %vm552_vm1, %v957_v27 }
 0x107   : > { %v958_v33 = vmax.f32 %v942_v30, 0.0  ;;  %v926_v34 = vadd.f32 %v897_v25, %v789_v32  ;;  %v945_v38 = vadd.f32 %v2693_v51, %v927_v31 }
 0x108   : > { %v2182_v39 = vpop.f32.mrf.mxu1 }
 0x109   : > { %v944_v40 = vadd.f32 %v2699_v55, %v926_v34  ;;  %v929_v41 = vadd.f32 %v2182_v39, %v901_v35  ;;  %2206 = vmatprep.mubr.msk.f32.mxu0 %vm552_vm1, %v958_v33  ;;  %v961_v48 = vmax.f32 %v945_v38, 0.0 }
 0x10a   : > { %v799_v42 = vpop.f32.mrf.mxu1  ;;  %2207 = vmatmul.mubr.msk.f32.gmra.mxu0 %vm552_vm1, %v959_v37 }
 0x10b   : > { %v960_v44 = vmax.f32 %v944_v40, 0.0  ;;  %v928_v45 = vadd.f32 %v901_v35, %v799_v42  ;;  %v947_v49 = vadd.f32 %v2693_v51, %v929_v41 }
 0x10c   : > { %v2185_v50 = vpop.f32.mrf.mxu1 }
 0x10d   : > { %v946_v52 = vadd.f32 %v2699_v55, %v928_v45  ;;  %v931_v53 = vadd.f32 %v2185_v50, %v905_v46  ;;  %2209 = vmatprep.mubr.msk.f32.mxu0 %vm552_vm1, %v960_v44  ;;  %v963_v59 = vmax.f32 %v947_v49, 0.0 }
 0x10e   : > { %v809_v54 = vpop.f32.mrf.mxu1  ;;  %2210 = vmatmul.mubr.msk.f32.gmra.mxu0 %vm552_vm1, %v961_v48 }
 0x10f   : > { %v962_v56 = vmax.f32 %v946_v52, 0.0  ;;  %v930_v57 = vadd.f32 %v905_v46, %v809_v54  ;;  %v949_v60 = vadd.f32 %v2693_v51, %v931_v53 }
 0x110   : > { %v2188_v61 = vpop.f32.mrf.mxu1 }
 0x111   : > { %v948_v62 = vadd.f32 %v2699_v55, %v930_v57  ;;  %v933_v63 = vadd.f32 %v2188_v61, %v909_v58  ;;  %2212 = vmatprep.mubr.msk.f32.mxu0 %vm552_vm1, %v962_v56  ;;  %v965_v3 = vmax.f32 %v949_v60, 0.0 }
 0x112   : > { %v819_v0 = vpop.f32.mrf.mxu1  ;;  %2213 = vmatmul.mubr.msk.f32.gmra.mxu0 %vm552_vm1, %v963_v59 }
 0x113   : > { %v964_v1 = vmax.f32 %v948_v62, 0.0  ;;  %v932_v2 = vadd.f32 %v909_v58, %v819_v0  ;;  %v951_v5 = vadd.f32 %v2693_v51, %v933_v63  ;;  %v1299_v51 = vld [vmem:[%s2990_s8 + $0x18] sm:$0xff] }
 0x114   : > { %2233 = vmatpush3.msra.mxu1 %v1299_v51 }
 0x115   : > { %v950_v6 = vadd.f32 %v2699_v55, %v932_v2  ;;  %2215 = vmatprep.mubr.msk.f32.mxu0 %vm552_vm1, %v964_v1  ;;  %v967_v7 = vmax.f32 %v951_v5, 0.0  ;;  %2234 = vmatprep.subr.mxu1 %v2430_v4  ;;  %v1302_v55 = vld [vmem:[%s2991_s9 + $0x10] sm:$0xff] }
 0x116   : > { %2216 = vmatmul.mubr.msk.f32.gmra.mxu0 %vm552_vm1, %v965_v3  ;;  %2235 = vmatpush3.msra.mxu1 %v1298_v9 }
 0x117   : > { %v966_v43 = vmax.f32 %v950_v6, 0.0  ;;  %2224 = vmatpush3.msra.mxu0 %v1302_v55  ;;  %2236 = vmatprep.subr.mxu1 %v2430_v4 }
 0x118   : > { %2225 = vmatprep.subr.mxu0 %v2430_v4  ;;  %2237 = vmatpush3.msra.mxu1 %v1297_v10 }
 0x119   : > { %2218 = vmatprep.mubr.msk.f32.mxu0 %vm552_vm1, %v966_v43  ;;  %2238 = vmatprep.subr.mxu1 %v2430_v4 }
 0x11a   : > { %2219 = vmatmul.mubr.msk.f32.gmra.mxu0 %vm552_vm1, %v967_v7  ;;  %2239 = vmatpush3.msra.mxu1 %v1296_v13 }
 0x11b   : > { %2229 = vmatprep.mubr.msk.f32.mxu0 %vm2431_vm3, %v2430_v4  ;;  %2226 = vmatpush3.msra.mxu0 %v1301_v12 }
 0x11c   : > { %2227 = vmatprep.subr.mxu0 %v2430_v4  ;;  %2241 = vmatmul.mubr.msk.f32.vlgmr.msra.gmra.mxu1 %vm552_vm1, %v2624_v11 }
 0x11d   : > { %2228 = vmatpush3.msra.mxu0 %v1300_v14 }
 0x11e   : > { %2243 = vmatprep.subr.mxu0 %v2430_v4 }
 0x1be   : > { %v2199_v16 = vpop.f32.mrf.mxu0 }
 0x1bf   : > { %v1099_v17 = vadd.f32 %v2199_v16, %v2777_v15 }
 0x1c0   : > { %v1093_v18 = vpop.f32.mrf.mxu0 }
 0x1c1   : > { %v1173_v19 = vmax.f32 %v1099_v17, 0.0  ;;  %v1094_v20 = vadd.f32 %v2777_v15, %v1093_v18 }
 0x1c2   : > { %v2202_v21 = vpop.f32.mrf.mxu0 }
 0x1c3   : > { %1189 = vst.msk [vmem:[%s2588_s14 + $0x8] sm:$0xff] %vm552_vm1, %v1173_v19  ;;  %v1172_v11 = vmax.f32 %v1094_v20, 0.0  ;;  %v1109_v22 = vadd.f32 %v2202_v21, %v2777_v15  ;;  %v1221_v31 = vsel %vm552_vm1, %v1173_v19, 0.0 }
 0x1c4   : > { %v1103_v23 = vpop.f32.mrf.mxu0 }
 0x1c5   : > { %1188 = vst.msk [vmem:[%s2588_s14] sm:$0xff] %vm552_vm1, %v1172_v11  ;;  %v1175_v24 = vmax.f32 %v1109_v22, 0.0  ;;  %v1104_v25 = vadd.f32 %v2777_v15, %v1103_v23  ;;  %v1206_v27 = vsel %vm552_vm1, %v1172_v11, 0.0 }
 0x1c6   : > { %v2205_v26 = vpop.f32.mrf.mxu0  ;;  %v1240_v34 = vadd.f32 %v1221_v31, %v1206_v27 }
 0x1c7   : > { %1191 = vst.msk [vmem:[%s2588_s14 + $0x18] sm:$0xff] %vm552_vm1, %v1175_v24  ;;  %v1174_v28 = vmax.f32 %v1104_v25, 0.0  ;;  %v1119_v29 = vadd.f32 %v2205_v26, %v2777_v15  ;;  %v1222_v45 = vsel %vm552_vm1, %v1175_v24, 0.0 }
 0x1c8   : > { %v1113_v30 = vpop.f32.mrf.mxu0  ;;  %v1241_v44 = vrot.slane %v1240_v34, 4  ;;  %v1223_v1 = vadd.f32 %v1222_v45, %v1221_v31 }
 0x1c9   : > { %1190 = vst.msk [vmem:[%s2588_s14 + $0x10] sm:$0xff] %vm552_vm1, %v1174_v28  ;;  %v1177_v32 = vmax.f32 %v1119_v29, 0.0  ;;  %v1114_v33 = vadd.f32 %v2777_v15, %v1113_v30  ;;  %v1207_v38 = vsel %vm552_vm1, %v1174_v28, 0.0 }
 0x1ca   : > { %v2208_v35 = vpop.f32.mrf.mxu0  ;;  %v1247_v47 = vadd.f32 %v1222_v45, %v1207_v38  ;;  %v2812_v58 = vadd.f32 %v1241_v44, %v1240_v34  ;;  %v1208_v2 = vadd.f32 %v1207_v38, %v1206_v27 }
 0x1cb   : > { %1193 = vst.msk [vmem:[%s2588_s14 + $0x28] sm:$0xff] %vm552_vm1, %v1177_v32  ;;  %v1176_v36 = vmax.f32 %v1114_v33, 0.0  ;;  %v1129_v37 = vadd.f32 %v2208_v35, %v2777_v15  ;;  %v1224_v48 = vsel %vm552_vm1, %v1177_v32, 0.0 }
 0x1cc   : > { %v1123_v39 = vpop.f32.mrf.mxu0  ;;  %v1248_v61 = vrot.slane %v1247_v47, 4  ;;  %v1243_v55 = vrot.slane %v2812_v58, 2  ;;  %v1225_v9 = vadd.f32 %v1224_v48, %v1223_v1 }
 0x1cd   : > { %1192 = vst.msk [vmem:[%s2588_s14 + $0x20] sm:$0xff] %vm552_vm1, %v1176_v36  ;;  %v1209_v40 = vsel %vm552_vm1, %v1176_v36, 0.0  ;;  %v1179_v41 = vmax.f32 %v1129_v37, 0.0  ;;  %v1124_v42 = vadd.f32 %v2777_v15, %v1123_v39 }
 0x1ce   : > { %v2211_v46 = vpop.f32.mrf.mxu0  ;;  %v1254_v52 = vadd.f32 %v1224_v48, %v1209_v40  ;;  %v1249_v13 = vadd.f32 %v1248_v61, %v1247_v47  ;;  %v1210_v14 = vadd.f32 %v1209_v40, %v1208_v2  ;;  %v1244_v61 = vadd.f32 %v1243_v55, %v2812_v58 }
 0x1cf   : > { %1195 = vst.msk [vmem:[%s2588_s14 + $0x38] sm:$0xff] %vm552_vm1, %v1179_v41  ;;  %v1178_v49 = vmax.f32 %v1124_v42, 0.0  ;;  %v1139_v50 = vadd.f32 %v2211_v46, %v2777_v15  ;;  %v1226_v59 = vsel %vm552_vm1, %v1179_v41, 0.0 }
 0x1d0   : > { %v1133_v53 = vpop.f32.mrf.mxu0  ;;  %v1255_v3 = vrot.slane %v1254_v52, 4  ;;  %v1227_v19 = vadd.f32 %v1226_v59, %v1225_v9  ;;  %v1250_v31 = vrot.slane %v1249_v13, 2  ;;  %v1245_v9 = vrot.slane %v1244_v61, 1 }
 0x1d1   : > { %1194 = vst.msk [vmem:[%s2588_s14 + $0x30] sm:$0xff] %vm552_vm1, %v1178_v49  ;;  %v1211_v54 = vsel %vm552_vm1, %v1178_v49, 0.0  ;;  %v1181_v56 = vmax.f32 %v1139_v50, 0.0  ;;  %v1134_v57 = vadd.f32 %v2777_v15, %v1133_v53 }
 0x1d2   : > { %v2214_v60 = vpop.f32.mrf.mxu0  ;;  %v1261_v62 = vadd.f32 %v1226_v59, %v1211_v54  ;;  %v1256_v18 = vadd.f32 %v1255_v3, %v1254_v52  ;;  %v1212_v26 = vadd.f32 %v1211_v54, %v1210_v14  ;;  %v1251_v49 = vadd.f32 %v1250_v31, %v1249_v13  ;;  %v1205_v52 = vld [vmem:[#allocation2 + $0x8] sm:$0xff]  ;;  %v1204_v3 = vld [vmem:[#allocation2] sm:$0xff] }
 0x1d3   : > { %1197 = vst.msk [vmem:[%s2588_s14 + $0x48] sm:$0xff] %vm552_vm1, %v1181_v56  ;;  %v1180_v63 = vmax.f32 %v1134_v57, 0.0  ;;  %v1149_v0 = vadd.f32 %v2214_v60, %v2777_v15  ;;  %v1228_v5 = vsel %vm552_vm1, %v1181_v56, 0.0 }
 0x1d4   : > { %v1143_v6 = vpop.f32.mrf.mxu0  ;;  %v1262_v43 = vrot.slane %v1261_v62, 4  ;;  %v1229_v27 = vadd.f32 %v1228_v5, %v1227_v19  ;;  %v1257_v35 = vrot.slane %v1256_v18, 2 }
 0x1d5   : > { %1196 = vst.msk [vmem:[%s2588_s14 + $0x40] sm:$0xff] %vm552_vm1, %v1180_v63  ;;  %v1213_v7 = vsel %vm552_vm1, %v1180_v63, 0.0  ;;  %v1183_v8 = vmax.f32 %v1149_v0, 0.0  ;;  %v1144_v51 = vadd.f32 %v2777_v15, %v1143_v6 }
 0x1d6   : > { %v1268_v10 = vadd.f32 %v1228_v5, %v1213_v7  ;;  %v2217_v12 = vpop.f32.mrf.mxu0  ;;  %v1263_v20 = vadd.f32 %v1262_v43, %v1261_v62  ;;  %v1214_v36 = vadd.f32 %v1213_v7, %v1212_v26  ;;  %v1258_v56 = vadd.f32 %v1257_v35, %v1256_v18 }
 0x1d7   : > { %1199 = vst.msk [vmem:[%s2588_s14 + $0x58] sm:$0xff] %vm552_vm1, %v1183_v8  ;;  %v1182_v16 = vmax.f32 %v1144_v51, 0.0  ;;  %v1159_v17 = vadd.f32 %v2217_v12, %v2777_v15  ;;  %v1230_v22 = vsel %vm552_vm1, %v1183_v8, 0.0  ;;  %v1252_v5 = vrot.slane %v1251_v49, 1 }
 0x1d8   : > { %v1269_v21 = vrot.slane %v1268_v10, 4  ;;  %v1153_v11 = vpop.f32.mrf.mxu0  ;;  %v1231_v37 = vadd.f32 %v1230_v22, %v1229_v27  ;;  %v1264_v40 = vrot.slane %v1263_v20, 2  ;;  %v1259_v8 = vrot.slane %v1258_v56, 1 }
 0x1d9   : > { %1198 = vst.msk [vmem:[%s2588_s14 + $0x50] sm:$0xff] %vm552_vm1, %v1182_v16  ;;  %v1215_v23 = vsel %vm552_vm1, %v1182_v16, 0.0  ;;  %v1185_v24 = vmax.f32 %v1159_v17, 0.0  ;;  %v1154_v25 = vadd.f32 %v2777_v15, %v1153_v11  ;;  %v1253_v14 = vadd.f32 %v1252_v5, %v1251_v49 }
 0x1da   : > { %v1270_v28 = vadd.f32 %v1269_v21, %v1268_v10  ;;  %v1275_v29 = vadd.f32 %v1230_v22, %v1215_v23  ;;  %v2220_v30 = vpop.f32.mrf.mxu0  ;;  %v1216_v50 = vadd.f32 %v1215_v23, %v1214_v36  ;;  %v1260_v18 = vadd.f32 %v1259_v8, %v1258_v56  ;;  %v1480_v36 = vld [vmem:[%s2993_s11 + $0x18] sm:$0xff] }
 0x1db   : > { %1201 = vst.msk [vmem:[%s2588_s14 + $0x68] sm:$0xff] %vm552_vm1, %v1185_v24  ;;  %v1232_v32 = vsel %vm552_vm1, %v1185_v24, 0.0  ;;  %v1184_v33 = vmax.f32 %v1154_v25, 0.0  ;;  %v1169_v34 = vadd.f32 %v2220_v30, %v2777_v15 }
 0x1dc   : > { %v1276_v38 = vrot.slane %v1275_v29, 4  ;;  %v1163_v39 = vpop.f32.mrf.mxu0  ;;  %v1271_v45 = vrot.slane %v1270_v28, 2  ;;  %v1233_v47 = vadd.f32 %v1232_v32, %v1231_v37  ;;  %v1464_v35 = vpop.f32.mrf.mxu1 }
 0x1dd   : > { %1200 = vst.msk [vmem:[%s2588_s14 + $0x60] sm:$0xff] %vm552_vm1, %v1184_v33  ;;  %v1217_v41 = vsel %vm552_vm1, %v1184_v33, 0.0  ;;  %v1187_v42 = vmax.f32 %v1169_v34, 0.0  ;;  %v1164_v44 = vadd.f32 %v2777_v15, %v1163_v39  ;;  %v1265_v15 = vadd.f32 %v1264_v40, %v1263_v20  ;;  %v1478_v39 = vld [vmem:[%s2993_s11 + $0x8] sm:$0xff]  ;;  %v1477_v40 = vld [vmem:[%s2993_s11] sm:$0xff] }
 0x1de   : > { %v1277_v46 = vadd.f32 %v1276_v38, %v1275_v29  ;;  %v1282_v48 = vadd.f32 %v1232_v32, %v1217_v41  ;;  %v1218_v62 = vadd.f32 %v1217_v41, %v1216_v50  ;;  %v1272_v0 = vadd.f32 %v1271_v45, %v1270_v28  ;;  %v2242_v37 = vpop.f32.mrf.mxu1  ;;  %v1479_v38 = vld [vmem:[%s2993_s11 + $0x10] sm:$0xff] }
 0x1df   : > { %1203 = vst.msk [vmem:[%s2588_s14 + $0x78] sm:$0xff] %vm552_vm1, %v1187_v42  ;;  %v1234_v53 = vsel %vm552_vm1, %v1187_v42, 0.0  ;;  %v1186_v54 = vmax.f32 %v1164_v44, 0.0  ;;  %v1266_v58 = vrot.slane %v1265_v15, 1  ;;  %v1246_v20 = vadd.f32 %v1245_v9, %v1244_v61  ;;  %v2038_v42 = vld [vmem:[%s2992_s10] ss:$0 sm:$0xff] }
 0x1e0   : > { %v1278_v57 = vrot.slane %v1277_v46, 2  ;;  %v1283_v59 = vrot.slane %v1282_v48, 4  ;;  %v1235_v60 = vadd.f32 %v1234_v53, %v1233_v47  ;;  %v1273_v12 = vrot.slane %v1272_v0, 1 }
 0x1e1   : > { %1202 = vst.msk [vmem:[%s2588_s14 + $0x70] sm:$0xff] %vm552_vm1, %v1186_v54  ;;  %v1219_v63 = vsel %vm552_vm1, %v1186_v54, 0.0  ;;  %v1267_v21 = vadd.f32 %v1266_v58, %v1265_v15  ;;  %v1313_v23 = vsel %vm1312_vm4, %v1253_v14, %v1246_v20 }
 0x1e2   : > { %v1284_v1 = vadd.f32 %v1283_v59, %v1282_v48  ;;  %v1237_v2 = vadd.f32 %v1235_v60, %v1205_v52  ;;  %v1279_v6 = vadd.f32 %v1278_v57, %v1277_v46  ;;  %v1220_v43 = vadd.f32 %v1219_v63, %v1218_v62 }
 0x1e3   : > { %v1289_v7 = vadd.f32 %v1234_v53, %v1219_v63  ;;  %v1274_v22 = vadd.f32 %v1273_v12, %v1272_v0  ;;  %v1315_v26 = vsel %vm1314_vm5, %v1260_v18, %v1313_v23 }
 0x1e4   : > { %v1285_v51 = vrot.slane %v1284_v1, 2  ;;  %1239 = vst.msk [vmem:[#allocation2 + $0x8] sm:$0xff] %vm552_vm1, %v1237_v2  ;;  %v1236_v55 = vadd.f32 %v1220_v43, %v1204_v3  ;;  %v1280_v16 = vrot.slane %v1279_v6, 1  ;;  %v1317_v28 = vsel %vm1316_vm6, %v1267_v21, %v1315_v26 }
 0x1e5   : > { %v1290_v10 = vrot.slane %v1289_v7, 4  ;;  %v1319_v30 = vsel %vm1318_vm7, %v1274_v22, %v1317_v28 }
 0x1e6   : > { %v1286_v13 = vadd.f32 %v1285_v51, %v1284_v1  ;;  %1238 = vst.msk [vmem:[#allocation2] sm:$0xff] %vm552_vm1, %v1236_v55  ;;  %v1281_v24 = vadd.f32 %v1280_v16, %v1279_v6 }
 0x1e7   : > { %v1291_v17 = vadd.f32 %v1290_v10, %v1289_v7 }
 0x1e8   : > { %v1287_v19 = vrot.slane %v1286_v13, 1  ;;  %v1321_v32 = vsel %vm1320_vm8, %v1281_v24, %v1319_v30 }
 0x1e9   : > { %v1292_v11 = vrot.slane %v1291_v17, 2 }
 0x1ea   : > { %v1288_v27 = vadd.f32 %v1287_v19, %v1286_v13 }
 0x1eb   : > { %v1293_v25 = vadd.f32 %v1292_v11, %v1291_v17 }
 0x1ec   : > { %v1323_v33 = vsel %vm1322_vm9, %v1288_v27, %v1321_v32 }
 0x1ed   : > { %v1294_v29 = vrot.slane %v1293_v25, 1 }
 0x1ef   : > { %v1295_v31 = vadd.f32 %v1294_v29, %v1293_v25 }
 0x1f1   : > { %v1325_v34 = vsel %vm1324_vm10, %v1295_v31, %v1323_v33 }
 0x1f2   : > { %2230 = vmatmul.mubr.msk.f32.vlgmr.msra.gmra.mxu0 %vm552_vm1, %v1325_v34 }
 0x1f3   : > { %2251 = vmatprep.mubr.msk.f32.mxu0 %vm2431_vm3, %v2430_v4  ;;  %2244 = vmatpush3.msra.mxu0 %v1480_v36 }
 0x1f4   : > { %2245 = vmatprep.subr.mxu0 %v2430_v4 }
 0x1f5   : > { %2246 = vmatpush3.msra.mxu0 %v1479_v38 }
 0x1f6   : > { %2247 = vmatprep.subr.mxu0 %v2430_v4 }
 0x1f7   : > { %2248 = vmatpush3.msra.mxu0 %v1478_v39 }
 0x1f8   : > { %2249 = vmatprep.subr.mxu0 %v2430_v4  ;;  %v2039_v4 = vld [vmem:[%s2994_s12] ss:$0 sm:$0xff] }
 0x1f9   : > { %2250 = vmatpush3.msra.mxu0 %v1477_v40 }
 0x2b2   : > { %v1394_v41 = vpop.f32.mrf.mxu0 }
 0x2b3   : > { %v1465_v44 = vadd.f32 %v1464_v35, %v1394_v41 }
 0x2b4   : > { %v2231_v45 = vpop.f32.mrf.mxu0 }
 0x2b5   : > { %v1475_v46 = vadd.f32 %v2038_v42, %v1465_v44 }
 0x2b7   : > { %v1476_v47 = vmax.f32 %v1475_v46, 0.0 }
 0x2b9   : > { %2252 = vmatmul.mubr.msk.f32.vlgmr.msra.gmra.mxu0 %vm552_vm1, %v1476_v47 }
 0x379   : > { %v1557_v48 = vpop.f32.mrf.mxu0 }
 0x37a   : > { %v1558_v49 = vadd.f32 %v2039_v4, %v1557_v48  ;;  %1566 = sbr.rel (%p2041_p13) target bundleno = 1308 (0x51c), region = 80 }
 0x37b   : > { %v2253_v50 = vpop.f32.mrf.mxu0 }
 0x37c   : > { %v1561_v52 = vmax.f32 %v1558_v49, 0.0 }
 0x37e   : > { %1562 = vst.msk [vmem:[%s505_s28] sm:$0xff] %vm552_vm1, %v1561_v52 }
 0x37f   : > { %v1578_v53 = vld [vmem:[%s2991_s9 + $0x18] sm:$0xff]  ;;  %v1577_v56 = vld [vmem:[%s2991_s9 + $0x10] sm:$0xff]  ;;  %v1576_v59 = vld [vmem:[%s2991_s9 + $0x8] sm:$0xff] }
 0x380   : > { %v1572_v54 = vld [vmem:[%s2990_s8 + $0x18] sm:$0xff]  ;;  %2254 = vmatprep.subr.mxu0 %v1578_v53  ;;  %v1571_v57 = vld [vmem:[%s2990_s8 + $0x10] sm:$0xff]  ;;  %v1570_v60 = vld [vmem:[%s2990_s8 + $0x8] sm:$0xff] }
 0x381   : > { %2265 = vmatprep.subr.mxu1 %v1572_v54  ;;  %2255 = vmatpush3.msra.mxu0 %v1578_v53  ;;  %v1575_v61 = vld [vmem:[%s2991_s9] sm:$0xff]  ;;  %v1574_v0 = vld [vmem:[#allocation2 + $0x8] sm:$0xff]  ;;  %v1755_v2 = vld [vmem:[%s2993_s11 + $0x18] sm:$0xff] }
 0x382   : > { %2266 = vmatpush3.msra.mxu1 %v1572_v54  ;;  %2256 = vmatprep.subr.mxu0 %v1577_v56  ;;  %v1569_v15 = vld [vmem:[%s2990_s8] sm:$0xff]  ;;  %v1568_v1 = vld [vmem:[%s2984_s2 + $0x8] sm:$0xff]  ;;  %v1754_v3 = vld [vmem:[%s2993_s11 + $0x10] sm:$0xff] }
 0x383   : > { %2267 = vmatprep.subr.mxu1 %v1571_v57  ;;  %2257 = vmatpush3.msra.mxu0 %v1577_v56  ;;  %v1573_v62 = vld [vmem:[#allocation2] sm:$0xff]  ;;  %v1753_v5 = vld [vmem:[%s2993_s11 + $0x8] sm:$0xff] }
 0x384   : > { %2268 = vmatpush3.msra.mxu1 %v1571_v57  ;;  %2258 = vmatprep.subr.mxu0 %v1576_v59  ;;  %v1567_v63 = vld [vmem:[%s2984_s2] sm:$0xff] }
 0x385   : > { %2269 = vmatprep.subr.mxu1 %v1570_v60  ;;  %2259 = vmatpush3.msra.mxu0 %v1576_v59  ;;  %v1752_v6 = vld [vmem:[%s2993_s11] sm:$0xff] }
 0x386   : > { %2270 = vmatpush3.msra.mxu1 %v1570_v60  ;;  %2260 = vmatprep.subr.mxu0 %v1575_v61  ;;  %v2046_v51 = vld [vmem:[%s2992_s10] ss:$0 sm:$0xff] }
 0x387   : > { %2271 = vmatprep.subr.mxu1 %v1569_v15  ;;  %2261 = vmatpush3.msra.mxu0 %v1575_v61  ;;  %v2047_v16 = vld [vmem:[%s2994_s12] ss:$0 sm:$0xff] }
 0x388   : > { %2262 = vmatprep.mubr.msk.f32.mxu0 %vm552_vm1, %v1573_v62  ;;  %2272 = vmatpush3.msra.mxu1 %v1569_v15 }
 0x389   : > { %2273 = vmatprep.mubr.msk.f32.mxu1 %vm552_vm1, %v1567_v63  ;;  %2263 = vmatmul.mubr.msk.f32.vlgmr.msra.gmra.mxu0 %vm552_vm1, %v1574_v0 }
 0x38a   : > { %2274 = vmatmul.mubr.msk.f32.vlgmr.msra.gmra.mxu1 %vm552_vm1, %v1568_v1  ;;  %2276 = vmatprep.subr.mxu0 %v1755_v2 }
 0x38b   : > { %2277 = vmatpush3.msra.mxu0 %v1755_v2 }
 0x38c   : > { %2278 = vmatprep.subr.mxu0 %v1754_v3 }
 0x38d   : > { %2279 = vmatpush3.msra.mxu0 %v1754_v3 }
 0x38e   : > { %2280 = vmatprep.subr.mxu0 %v1753_v5 }
 0x38f   : > { %2281 = vmatpush3.msra.mxu0 %v1753_v5 }
 0x390   : > { %2282 = vmatprep.subr.mxu0 %v1752_v6 }
 0x391   : > { %2283 = vmatpush3.msra.mxu0 %v1752_v6 }
 0x449   : > { %v2264_v43 = vpop.f32.mrf.mxu0 }
 0x44a   : > { %v2275_v7 = vpop.f32.mrf.mxu1 }
 0x44b   : > { %v1738_v8 = vadd.f32 %v2275_v7, %v2264_v43  ;;  %v1651_v9 = vpop.f32.mrf.mxu0 }
 0x44c   : > { %v1732_v58 = vpop.f32.mrf.mxu1 }
 0x44d   : > { %v1733_v55 = vadd.f32 %v1732_v58, %v1651_v9  ;;  %v1749_v10 = vadd.f32 %v2046_v51, %v1738_v8 }
 0x44f   : > { %v1748_v12 = vadd.f32 %v2046_v51, %v1733_v55  ;;  %v1751_v14 = vmax.f32 %v1749_v10, 0.0 }
 0x451   : > { %v1750_v13 = vmax.f32 %v1748_v12, 0.0 }
 0x453   : > { %2284 = vmatprep.mubr.msk.f32.mxu0 %vm552_vm1, %v1750_v13 }
 0x454   : > { %2285 = vmatmul.mubr.msk.f32.vlgmr.msra.gmra.mxu0 %vm552_vm1, %v1751_v14 }
 0x514   : > { %v2286_v17 = vpop.f32.mrf.mxu0 }
 0x515   : > { %v1841_v18 = vadd.f32 %v2286_v17, %v2047_v16 }
 0x516   : > { %v1835_v19 = vpop.f32.mrf.mxu0 }
 0x517   : > { %v1845_v20 = vmax.f32 %v1841_v18, 0.0  ;;  %v1836_v21 = vadd.f32 %v2047_v16, %v1835_v19 }
 0x519   : > { %1847 = vst.msk [vmem:[#allocation5 + $0x8] sm:$0xff] %vm552_vm1, %v1845_v20  ;;  %v1844_v11 = vmax.f32 %v1836_v21, 0.0 }
 0x51b   : > { %1846 = vst.msk [vmem:[#allocation5] sm:$0xff] %vm552_vm1, %v1844_v11 }
 0x51c PF: > { %s2051_s18 = sshll.u32 %s2538_s22, 7  ;;  %s3021_s29 = sld [smem:[#allocation16_spill]] }
 0x51d   : > { %s1871_s23 = sshll.u32 %s505_s28, 4  ;;  %s3022_s25 = sand.u32 1, %s2419_s19   ;;  %s1872_s23 = int_to_ptr.vmem [resolvable:$true] %s1871_s23 }
 0x51e   : > { %s1854_s14 = scalar_lea.sflag [#allocation4], %s3022_s25  ;;  %s2339_s20 = scalar_lea.vmem %s1872_s23, 128 }
 0x51f   : > { %p2340_p0 = scmp.ne.s32.totalorder %s1872_s23, %s2339_s20  ;;  %s2433_s26 = smov [#allocation3]  }
 0x520   : > { %s2343_s21 = sshll.u32 %s2433_s26, 4  ;;  %s2344_s21 = int_to_ptr.vmem [resolvable:$false] %s2343_s21 }
 0x521   : > { %p2341_p1 = pnand %p2340_p0, %p2557_p5  ;;  %s2345_s27 = scalar_lea.vmem %s2344_s21, 256 }
 0x522   : > { %s1869_s30 = scalar_lea.hbm %s3021_s29, %s2051_s18  ;;  %p2346_p4 = scmp.lt.s32.totalorder %s1872_s23, %s2344_s21 }
 0x523   : > { %p2342_p3 = pneg %p2341_p1  ;;  %p2347_p7 = scmp.lt.s32.totalorder %s2345_s27, %s2339_s20 }
 0x525   : > { %p2348_p8 = por %p2347_p7, %p2346_p4 }
 0x527   : > { %p2349_p9 = pnand %p2348_p8, %p2342_p3 }
 0x529   : > { %2352 = shalt.err (!%p2349_p9)
}
 0x52a   : > { %s2353_s18 = scalar_lea.hbm %s1869_s30, 128  ;;  %s2357_s24 = scalar_lea.hbm %s3021_s29, 256 }
 0x52b   : > { %p2354_p10 = scmp.ne.s32.totalorder %s1869_s30, %s2353_s18  ;;  %p2358_p13 = scmp.lt.s32.totalorder %s1869_s30, %s3021_s29 }
 0x52c   : > { %p2359_p0 = scmp.lt.s32.totalorder %s2357_s24, %s2353_s18 }
 0x52d   : > { %p2355_p11 = pnand %p2354_p10, %p2557_p5 }
 0x52e   : > { %p2360_p1 = por %p2359_p0, %p2358_p13 }
 0x52f   : > { %p2356_p12 = pneg %p2355_p11 }
 0x531   : > { %p2361_p2 = pnand %p2360_p1, %p2356_p12 }
 0x533   : > { %2364 = shalt.err (!%p2361_p2)
}
 0x534   : > { %2287 = dma.vmem_to_hbm [thread:$0]  (%p2557_p5), %s1872_s23, 128, %s1869_s30, %s1854_s14  }
 0x535   : > { %s2434_s20 = smov [#allocation5]   ;;  %p3023_p4 = scmp.eq.s32.totalorder %s2538_s22, 1 }
 0x536   : > { %s1881_s26 = sshll.u32 %s2434_s20, 4  ;;  %s1882_s26 = int_to_ptr.vmem [resolvable:$true] %s1881_s26 }
 0x537   : > { %s2365_s21 = scalar_lea.vmem %s1882_s26, 256  ;;  %p2372_p9 = scmp.lt.s32.totalorder %s1882_s26, %s1882_s26 }
 0x538   : > { %p2366_p3 = scmp.ne.s32.totalorder %s1882_s26, %s2365_s21  ;;  %p2373_p10 = scmp.lt.s32.totalorder %s2365_s21, %s2365_s21 }
 0x53a   : > { %p2367_p7 = pnand %p2366_p3, %p3023_p4  ;;  %p2374_p11 = por %p2373_p10, %p2372_p9 }
 0x53c   : > { %p2368_p8 = pneg %p2367_p7 }
 0x53e   : > { %p2375_p6 = pnand %p2374_p11, %p2368_p8 }
 0x540   : > { %2378 = shalt.err (!%p2375_p6)
}
 0x541   : > { %s2435_s27 = smov 128   ;;  %s2436_s18 = smov 8  }
 0x542   : > { %p3024_p2 = pmov %p3023_p4  ;;  %s3025_s23 = sld [smem:[#allocation17_spill]] }
 0x544   : > { %p3026_p5 = pmov %p3024_p2 }
 0x548   : > { %2289 = dma.vmem_to_hbm [thread:$0]  (%p3024_p2), %s1882_s26, 256, %s3025_s23, [#allocation6], %s2435_s27, %s2435_s27, %s2436_s18  }
 0x549   : > { %2406 = dma.done.wait (%p3026_p5), [#allocation6], 256   ;;  %p3027_p12 = pmov %p3024_p2 }
 0x54b   : > { %2408 = vsyncadd (%p3027_p12), [#allocation6], 4294967040 }
 0x54c PF: > { %s3028_s14 = sld [smem:[#allocation11_spill]] }
 0x54d   : > { %s3029_s28 = sld [smem:[#allocation9_spill]] }
 0x54e   : > { %s3030_s17 = sld [smem:[#allocation15_spill]] }
 0x552   : > { %p2299_p13 = scmp.ge.s32.totalorder %s3028_s14, 2 }
 0x553   : > { %s1908_s24 = sand.u32 1, %s3029_s28  }
 0x554   : > { %p3031_p6 = scmp.ne.s32.totalorder %s3030_s17, 0  ;;  %s1909_s15 = scalar_lea.sflag [#allocation4], %s1908_s24 }
 0x556   : > { %p2294_p0 = pnand %p2299_p13, %p3031_p6 }
 0x558   : > { %p2295_p1 = pneg %p2294_p0 }
 0x55a   : > { %2410 = dma.done.wait (%p2295_p1), %s1909_s15, 128  }
 0x55b   : > { %2412 = vsyncadd (%p2295_p1), %s1909_s15, 4294967168  ;;  %s3032_s21 = sld [smem:[#allocation12_spill]]  ;;  %s3035_s18 = smov %s2419_s19 }
 0x55c   : > { %s3033_s25 = sld [smem:[#allocation10_spill]] }
 0x55d   : > { %s3034_s20 = sld [smem:[#allocation13_spill]] }
 0x561   : > { %p27_p3 = scmp.ge.s32.totalorder %s3032_s21, 4  }
 0x562   : > { %s3036_s19 = smov %s3033_s25 }
 0x563   :  { %29 = sbr.rel (!%p27_p3) target bundleno = 7 (0x7), region = 138 }
 0x568   :  { %1914 = vsyncpa [#allocation4], 1 }
 0x569   :  { %1916 = vsyncpa [#allocation4 + $0x1], 1 }
 0x56a   :  { %1917 = vsyncpa [#allocation6], 1 }

</bundles_post_ra>
